<compile_context>
chip_gen: v6e
topology: v6e:2x2x1
jax: 0.10.0
libtpu: 0.0.40
codegen_flags: <defaults>
</compile_context>

<pallas_src>
import jax
import jax.numpy as jnp
from jax.experimental import pallas as pl
from jax.experimental.pallas import tpu as pltpu


# ---------------------------------------------------------------------------
# Kernel
# ---------------------------------------------------------------------------

def _leaky_relu(h, slope=0.2):
    # For 0 < slope < 1, max(h, slope*h) == LeakyReLU(h): 2 VPU ops (mul+max).
    return jnp.maximum(h, slope * h)


def _mxu_dot(a, w_ref):
    # Activations stay f32; cast to bf16 at the MXU boundary (weights already
    # bf16), accumulate in f32.
    return jnp.dot(a.astype(jnp.bfloat16), w_ref[...],
                   preferred_element_type=jnp.float32)


def vae_kernel(
    x_ref, eps_ref,
    w_in_ref, b_in_ref, w_in2_ref, b_in2_ref,
    w_mv_ref, b_mv_ref,                      # fused mean/log_var head: (H, 2Lp), (1, 2Lp)
    w_d1_ref, b_d1_ref, w_d2_ref, b_d2_ref,
    w_do_ref, b_do_ref,
    xhat_ref, mv_ref,                        # x_hat (tb, Xp); fused [mean | log_var] (tb, 2Lp)
):
    lp = eps_ref.shape[1]                    # padded latent dim (multiple of 128)
    x = x_ref[...]

    # ---- Encoder ----
    h = _leaky_relu(_mxu_dot(x, w_in_ref) + b_in_ref[...])
    h = _leaky_relu(_mxu_dot(h, w_in2_ref) + b_in2_ref[...])
    mv = _mxu_dot(h, w_mv_ref) + b_mv_ref[...]   # one 2Lp-wide matmul
    mv_ref[...] = mv                             # single lane-dense store; split in wrapper

    mean = mv[:, :lp]                            # 128-lane-aligned in-kernel slices
    log_var = mv[:, lp:]

    # ---- Reparameterization: z = mean + exp(0.5*log_var) * eps ----
    # (eps pad columns are zero, so padded z stays zero.)
    z = mean + jnp.exp(0.5 * log_var) * eps_ref[...]

    # ---- Decoder ----
    d = _leaky_relu(_mxu_dot(z, w_d1_ref) + b_d1_ref[...])
    d = _leaky_relu(_mxu_dot(d, w_d2_ref) + b_d2_ref[...])
    t = _mxu_dot(d, w_do_ref) + b_do_ref[...]
    # sigmoid(t) == 0.5*(tanh(0.5*t)+1): one EUP op instead of exp + divide.
    xhat_ref[...] = 0.5 * (jnp.tanh(0.5 * t) + 1.0)


# ---------------------------------------------------------------------------
# One-time parameter preparation (hoisted out of the forward path)
# ---------------------------------------------------------------------------

def _round_up(n, m):
    return ((n + m - 1) // m) * m


def prepare_params(params):
    """One-time prep: pad all feature dims to multiples of 128 lanes, cast
    weights to bf16, and fuse the mu/log_var heads. Call once and reuse."""
    x_dim, hidden_dim = params["w_in"].shape
    latent_dim = params["w_mu"].shape[1]
    xp = _round_up(x_dim, 128)
    hp = _round_up(hidden_dim, 128)
    lp = _round_up(latent_dim, 128)

    def pad2(a, rows, cols):
        return jnp.pad(a, ((0, rows - a.shape[0]), (0, cols - a.shape[1])))

    bf16 = lambda a: a.astype(jnp.bfloat16)

    # Fused mean/log_var head: each half padded to a 128-lane boundary so the
    # in-kernel split and the z @ w_d1 matmul stay lane-aligned.
    w_mv = jnp.concatenate([pad2(params["w_mu"], hp, lp),
                            pad2(params["w_lv"], hp, lp)], axis=1)
    b_mv = jnp.concatenate([pad2(params["b_mu"], 1, lp),
                            pad2(params["b_lv"], 1, lp)], axis=1)

    weights_and_biases = (
        bf16(pad2(params["w_in"],  xp, hp)), pad2(params["b_in"],  1, hp),
        bf16(pad2(params["w_in2"], hp, hp)), pad2(params["b_in2"], 1, hp),
        bf16(w_mv),                          b_mv,
        bf16(pad2(params["w_d1"],  lp, hp)), pad2(params["b_d1"],  1, hp),
        bf16(pad2(params["w_d2"],  hp, hp)), pad2(params["b_d2"],  1, hp),
        bf16(pad2(params["w_do"],  hp, xp)), pad2(params["b_do"],  1, xp),
    )
    weights_and_biases = tuple(jax.device_put(a) for a in weights_and_biases)

    return {
        "weights": weights_and_biases,
        "dims": (x_dim, hidden_dim, latent_dim),
        "padded": (xp, hp, lp),
    }


# ---------------------------------------------------------------------------
# Forward wrapper
# ---------------------------------------------------------------------------

def gaussian_mlp_vae_forward(x, eps, prepared, *, batch_tile=None):
    """x: (B, x_dim) f32, eps: (B, latent_dim) f32, prepared: prepare_params(...)."""
    x_dim, hidden_dim, latent_dim = prepared["dims"]
    xp, hp, lp = prepared["padded"]
    weights = prepared["weights"]

    B = x.shape[0]
    assert x.shape == (B, x_dim) and eps.shape == (B, latent_dim)

    # Batch tile: as large as reasonable (amortize ~0.35us/step grid overhead),
    # but default to >= 2 grid steps so the parallel batch axis can use both
    # TensorCores on v7x.
    if batch_tile is None:
        if B > 8:
            batch_tile = min(512, _round_up(-(-B // 2), 8))
        else:
            batch_tile = _round_up(max(B, 1), 8)
    tb = _round_up(batch_tile, 8)
    Bp = _round_up(B, tb)
    grid = (Bp // tb,)

    # Wrapper-side zero-padding (pads contribute exact zeros through every
    # layer; eps pad = 0 keeps padded z = 0). Pads are sliced off afterwards.
    xq = jnp.pad(x, ((0, Bp - B), (0, xp - x_dim)))
    epsq = jnp.pad(eps, ((0, Bp - B), (0, lp - latent_dim)))

    def batch_spec(dim):
        return pl.BlockSpec((tb, dim), lambda i: (i, 0))

    def resident_spec_single(arr):
        # Full-array block + constant index_map -> DMA'd once, VMEM-resident;
        # Buffered(1) keeps a single buffer (halves weight VMEM residency).
        return pl.BlockSpec(arr.shape, lambda i: (0, 0),
                            pipeline_mode=pl.Buffered(1))

    def resident_spec_double(arr):
        return pl.BlockSpec(arr.shape, lambda i: (0, 0))

    io_in_specs = [batch_spec(xp), batch_spec(lp)]
    out_specs = (batch_spec(xp), batch_spec(2 * lp))
    out_shape = (
        jax.ShapeDtypeStruct((Bp, xp), jnp.float32),       # x_hat (padded)
        jax.ShapeDtypeStruct((Bp, 2 * lp), jnp.float32),   # fused [mean | log_var] (padded)
    )

    # VMEM budget: single-buffered weights + double-buffered I/O tiles +
    # activation temps + headroom. Capped at 64 MiB (v7x physical per-TC).
    w_bytes = sum(int(a.size) * a.dtype.itemsize for a in weights)
    io_bytes = 2 * 4 * tb * (xp + lp + xp + 2 * lp)          # double-buffered x/eps/x_hat/mv tiles
    act_bytes = 2 * 4 * tb * (2 * hp + 2 * lp + xp)          # in-kernel temps (generous)
    vmem_limit = min(w_bytes + io_bytes + act_bytes + (16 << 20), 64 << 20)

    flops = 2 * Bp * (
        xp * hp + hp * hp            # encoder FC_input / FC_input2
        + hp * 2 * lp                # fused mean/log_var head
        + lp * hp + hp * hp          # decoder FC_hidden / FC_hidden2
        + hp * xp)                   # decoder FC_output
    transcendentals = Bp * (lp + xp)                         # exp (reparam) + tanh (sigmoid)
    bytes_accessed = (int(xq.size) + int(epsq.size)) * 4 + w_bytes + Bp * (xp + 2 * lp) * 4

    def run(weight_specs):
        return pl.pallas_call(
            vae_kernel,
            grid=grid,
            in_specs=io_in_specs + weight_specs,
            out_specs=out_specs,
            out_shape=out_shape,
            compiler_params=pltpu.CompilerParams(
                dimension_semantics=("parallel",),
                vmem_limit_bytes=int(vmem_limit)),
            cost_estimate=pl.CostEstimate(
                flops=int(flops), transcendentals=int(transcendentals),
                bytes_accessed=int(bytes_accessed)),
        )(xq, epsq, *weights)

    try:
        xhat_p, mv_p = run([resident_spec_single(a) for a in weights])
    except Exception:
        # Fallback for JAX builds without BlockSpec.pipeline_mode: default
        # double-buffered resident weights (still only one DMA each, since the
        # block index never changes across the grid).
        xhat_p, mv_p = run([resident_spec_double(a) for a in weights])

    x_hat = xhat_p[:B, :x_dim]
    mean = mv_p[:B, :latent_dim]
    log_var = mv_p[:B, lp:lp + latent_dim]
    return x_hat, mean, log_var


# ---------------------------------------------------------------------------
# Parameter init (PyTorch nn.Linear-style) and pure-JAX reference
# ---------------------------------------------------------------------------

def init_params(key, x_dim, hidden_dim, latent_dim):
    """PyTorch-style uniform(-1/sqrt(fan_in), 1/sqrt(fan_in)) init.
    Weights stored as (in_features, out_features); biases as (1, out)."""
    def linear(key, fan_in, fan_out):
        kw, kb = jax.random.split(key)
        bound = 1.0 / jnp.sqrt(fan_in)
        w = jax.random.uniform(kw, (fan_in, fan_out), jnp.float32, -bound, bound)
        b = jax.random.uniform(kb, (1, fan_out), jnp.float32, -bound, bound)
        return w, b

    keys = jax.random.split(key, 7)
    p = {}
    p["w_in"],  p["b_in"]  = linear(keys[0], x_dim, hidden_dim)
    p["w_in2"], p["b_in2"] = linear(keys[1], hidden_dim, hidden_dim)
    p["w_mu"],  p["b_mu"]  = linear(keys[2], hidden_dim, latent_dim)
    p["w_lv"],  p["b_lv"]  = linear(keys[3], hidden_dim, latent_dim)
    p["w_d1"],  p["b_d1"]  = linear(keys[4], latent_dim, hidden_dim)
    p["w_d2"],  p["b_d2"]  = linear(keys[5], hidden_dim, hidden_dim)
    p["w_do"],  p["b_do"]  = linear(keys[6], hidden_dim, x_dim)
    return p


def reference_forward(x, eps, p):
    """Pure-JAX reference with the same bf16-weight / f32-accumulate numerics."""
    lrelu = lambda h: jnp.maximum(h, 0.2 * h)

    def lin(a, w, b):
        return jnp.dot(a.astype(jnp.bfloat16), w.astype(jnp.bfloat16),
                       preferred_element_type=jnp.float32) + b

    h = lrelu(lin(x, p["w_in"], p["b_in"]))
    h = lrelu(lin(h, p["w_in2"], p["b_in2"]))
    mean = lin(h, p["w_mu"], p["b_mu"])
    log_var = lin(h, p["w_lv"], p["b_lv"])
    z = mean + jnp.exp(0.5 * log_var) * eps
    d = lrelu(lin(z, p["w_d1"], p["b_d1"]))
    d = lrelu(lin(d, p["w_d2"], p["b_d2"]))
    x_hat = jax.nn.sigmoid(lin(d, p["w_do"], p["b_do"]))
    return x_hat, mean, log_var


# ---------------------------------------------------------------------------
# Self-test
# ---------------------------------------------------------------------------

if __name__ == "__main__":
    # Small, deliberately non-128-aligned feature dims to exercise the
    # wrapper-side lane padding; batch 16 with 8-row tiles -> grid of 2 steps.
    B, TB = 16, 8
    X_DIM, HIDDEN_DIM, LATENT_DIM = 200, 120, 48

    key = jax.random.PRNGKey(0)
    k_params, k_x, k_eps = jax.random.split(key, 3)

    params = init_params(k_params, X_DIM, HIDDEN_DIM, LATENT_DIM)
    prepared = prepare_params(params)    # one-time prep: pad + bf16 + fuse heads

    # Input in [0,1] like flattened image pixels (consistent with BCE loss usage).
    x = jax.random.uniform(k_x, (B, X_DIM), jnp.float32)
    # Reparameterization noise epsilon ~ N(0,1), generated outside the kernel
    # (torch.randn_like in the original module).
    # TODO(synk): could use pltpu.prng_seed + pltpu.stateful_normal in-kernel
    # if exact parity with host-side randn is not required.
    eps = jax.random.normal(k_eps, (B, LATENT_DIM), jnp.float32)

    x_hat, mean, log_var = gaussian_mlp_vae_forward(x, eps, prepared, batch_tile=TB)
    jax.block_until_ready((x_hat, mean, log_var))

    # Sanity-check against a pure-JAX reference with matching bf16 numerics.
    x_hat_ref, mean_ref, log_var_ref = reference_forward(x, eps, params)
    assert x_hat.shape == (B, X_DIM)
    assert mean.shape == (B, LATENT_DIM)
    assert log_var.shape == (B, LATENT_DIM)
    assert jnp.allclose(x_hat, x_hat_ref, atol=5e-3, rtol=5e-3)
    assert jnp.allclose(mean, mean_ref, atol=5e-3, rtol=5e-3)
    assert jnp.allclose(log_var, log_var_ref, atol=5e-3, rtol=5e-3)

    print("KERNEL_OK")
</pallas_src>

<mosaic_0001>
module attributes {stable_mosaic.version = 11 : i64} {
  func.func @vae_kernel(%arg0: i32, %arg1: memref<8x256xf32, #tpu.memory_space<vmem>>, %arg2: memref<8x128xf32, #tpu.memory_space<vmem>>, %arg3: memref<256x128xbf16, #tpu.memory_space<vmem>>, %arg4: memref<1x128xf32, #tpu.memory_space<vmem>>, %arg5: memref<128x128xbf16, #tpu.memory_space<vmem>>, %arg6: memref<1x128xf32, #tpu.memory_space<vmem>>, %arg7: memref<128x256xbf16, #tpu.memory_space<vmem>>, %arg8: memref<1x256xf32, #tpu.memory_space<vmem>>, %arg9: memref<128x128xbf16, #tpu.memory_space<vmem>>, %arg10: memref<1x128xf32, #tpu.memory_space<vmem>>, %arg11: memref<128x128xbf16, #tpu.memory_space<vmem>>, %arg12: memref<1x128xf32, #tpu.memory_space<vmem>>, %arg13: memref<128x256xbf16, #tpu.memory_space<vmem>>, %arg14: memref<1x256xf32, #tpu.memory_space<vmem>>, %arg15: memref<8x256xf32, #tpu.memory_space<vmem>>, %arg16: memref<8x256xf32, #tpu.memory_space<vmem>>) attributes {dimension_semantics = [#tpu.dimension_semantics<parallel>], iteration_bounds = array<i64: 2>, scalar_prefetch = 0 : i64, scratch_operands = 0 : i64, tpu.core_type = #tpu.core_type<tc>, window_params = [{transform_indices = @transform_0, window_bounds = array<i64: 8, 256>}, {transform_indices = @transform_1, window_bounds = array<i64: 8, 128>}, {pipeline_mode = #tpu.pipeline_mode<synchronous>, transform_indices = @transform_2, window_bounds = array<i64: 256, 128>}, {pipeline_mode = #tpu.pipeline_mode<synchronous>, transform_indices = @transform_3, window_bounds = array<i64: 1, 128>}, {pipeline_mode = #tpu.pipeline_mode<synchronous>, transform_indices = @transform_4, window_bounds = array<i64: 128, 128>}, {pipeline_mode = #tpu.pipeline_mode<synchronous>, transform_indices = @transform_5, window_bounds = array<i64: 1, 128>}, {pipeline_mode = #tpu.pipeline_mode<synchronous>, transform_indices = @transform_6, window_bounds = array<i64: 128, 256>}, {pipeline_mode = #tpu.pipeline_mode<synchronous>, transform_indices = @transform_7, window_bounds = array<i64: 1, 256>}, {pipeline_mode = #tpu.pipeline_mode<synchronous>, transform_indices = @transform_8, window_bounds = array<i64: 128, 128>}, {pipeline_mode = #tpu.pipeline_mode<synchronous>, transform_indices = @transform_9, window_bounds = array<i64: 1, 128>}, {pipeline_mode = #tpu.pipeline_mode<synchronous>, transform_indices = @transform_10, window_bounds = array<i64: 128, 128>}, {pipeline_mode = #tpu.pipeline_mode<synchronous>, transform_indices = @transform_11, window_bounds = array<i64: 1, 128>}, {pipeline_mode = #tpu.pipeline_mode<synchronous>, transform_indices = @transform_12, window_bounds = array<i64: 128, 256>}, {pipeline_mode = #tpu.pipeline_mode<synchronous>, transform_indices = @transform_13, window_bounds = array<i64: 1, 256>}, {transform_indices = @transform_14, window_bounds = array<i64: 8, 256>}, {transform_indices = @transform_15, window_bounds = array<i64: 8, 256>}]} {
    %c0 = arith.constant 0 : index
    %c0_0 = arith.constant 0 : index
    %0 = vector.load %arg1[%c0, %c0_0] : memref<8x256xf32, #tpu.memory_space<vmem>>, vector<8x256xf32>
    %1 = arith.truncf %0 : vector<8x256xf32> to vector<8x256xbf16>
    %c0_1 = arith.constant 0 : index
    %c0_2 = arith.constant 0 : index
    %2 = vector.load %arg3[%c0_1, %c0_2] : memref<256x128xbf16, #tpu.memory_space<vmem>>, vector<256x128xbf16>
    %cst = arith.constant dense<0.000000e+00> : vector<8x128xf32>
    %3 = tpu.matmul %1, %2, %cst {dimension_numbers = #tpu.dot_dimension_numbers<[1], [0], [0], [1], [0, 0, 1, 1], [], []>} : vector<8x256xbf16>, vector<256x128xbf16>, vector<8x128xf32> -> vector<8x128xf32>
    %c0_3 = arith.constant 0 : index
    %c0_4 = arith.constant 0 : index
    %4 = vector.load %arg4[%c0_3, %c0_4] : memref<1x128xf32, #tpu.memory_space<vmem>>, vector<1x128xf32>
    %5 = vector.broadcast %4 : vector<1x128xf32> to vector<8x128xf32>
    %6 = arith.addf %3, %5 : vector<8x128xf32>
    %cst_5 = arith.constant 2.000000e-01 : f32
    %7 = vector.broadcast %cst_5 : f32 to vector<8x128xf32>
    %8 = arith.mulf %7, %6 : vector<8x128xf32>
    %9 = arith.maximumf %6, %8 : vector<8x128xf32>
    %10 = arith.truncf %9 : vector<8x128xf32> to vector<8x128xbf16>
    %c0_6 = arith.constant 0 : index
    %c0_7 = arith.constant 0 : index
    %11 = vector.load %arg5[%c0_6, %c0_7] : memref<128x128xbf16, #tpu.memory_space<vmem>>, vector<128x128xbf16>
    %cst_8 = arith.constant dense<0.000000e+00> : vector<8x128xf32>
    %12 = tpu.matmul %10, %11, %cst_8 {dimension_numbers = #tpu.dot_dimension_numbers<[1], [0], [0], [1], [0, 0, 1, 1], [], []>} : vector<8x128xbf16>, vector<128x128xbf16>, vector<8x128xf32> -> vector<8x128xf32>
    %c0_9 = arith.constant 0 : index
    %c0_10 = arith.constant 0 : index
    %13 = vector.load %arg6[%c0_9, %c0_10] : memref<1x128xf32, #tpu.memory_space<vmem>>, vector<1x128xf32>
    %14 = vector.broadcast %13 : vector<1x128xf32> to vector<8x128xf32>
    %15 = arith.addf %12, %14 : vector<8x128xf32>
    %cst_11 = arith.constant 2.000000e-01 : f32
    %16 = vector.broadcast %cst_11 : f32 to vector<8x128xf32>
    %17 = arith.mulf %16, %15 : vector<8x128xf32>
    %18 = arith.maximumf %15, %17 : vector<8x128xf32>
    %19 = arith.truncf %18 : vector<8x128xf32> to vector<8x128xbf16>
    %c0_12 = arith.constant 0 : index
    %c0_13 = arith.constant 0 : index
    %20 = vector.load %arg7[%c0_12, %c0_13] : memref<128x256xbf16, #tpu.memory_space<vmem>>, vector<128x256xbf16>
    %cst_14 = arith.constant dense<0.000000e+00> : vector<8x256xf32>
    %21 = tpu.matmul %19, %20, %cst_14 {dimension_numbers = #tpu.dot_dimension_numbers<[1], [0], [0], [1], [0, 0, 1, 1], [], []>} : vector<8x128xbf16>, vector<128x256xbf16>, vector<8x256xf32> -> vector<8x256xf32>
    %c0_15 = arith.constant 0 : index
    %c0_16 = arith.constant 0 : index
    %22 = vector.load %arg8[%c0_15, %c0_16] : memref<1x256xf32, #tpu.memory_space<vmem>>, vector<1x256xf32>
    %23 = vector.broadcast %22 : vector<1x256xf32> to vector<8x256xf32>
    %24 = arith.addf %21, %23 : vector<8x256xf32>
    %c0_17 = arith.constant 0 : index
    %c0_18 = arith.constant 0 : index
    %25 = vector.load %arg16[%c0_17, %c0_18] : memref<8x256xf32, #tpu.memory_space<vmem>>, vector<8x256xf32>
    tpu.vector_store %arg16[%c0_17, %c0_18], %24 {strides = array<i32>} : memref<8x256xf32, #tpu.memory_space<vmem>>, vector<8x256xf32>,
    %26 = vector.extract_strided_slice %24 {offsets = [0, 0], sizes = [8, 128], strides = [1, 1]} : vector<8x256xf32> to vector<8x128xf32>
    %27 = vector.extract_strided_slice %24 {offsets = [0, 128], sizes = [8, 128], strides = [1, 1]} : vector<8x256xf32> to vector<8x128xf32>
    %cst_19 = arith.constant 5.000000e-01 : f32
    %28 = vector.broadcast %cst_19 : f32 to vector<8x128xf32>
    %29 = arith.mulf %28, %27 : vector<8x128xf32>
    %30 = math.exp %29 : vector<8x128xf32>
    %c0_20 = arith.constant 0 : index
    %c0_21 = arith.constant 0 : index
    %31 = vector.load %arg2[%c0_20, %c0_21] : memref<8x128xf32, #tpu.memory_space<vmem>>, vector<8x128xf32>
    %32 = arith.mulf %30, %31 : vector<8x128xf32>
    %33 = arith.addf %26, %32 : vector<8x128xf32>
    %34 = arith.truncf %33 : vector<8x128xf32> to vector<8x128xbf16>
    %c0_22 = arith.constant 0 : index
    %c0_23 = arith.constant 0 : index
    %35 = vector.load %arg9[%c0_22, %c0_23] : memref<128x128xbf16, #tpu.memory_space<vmem>>, vector<128x128xbf16>
    %cst_24 = arith.constant dense<0.000000e+00> : vector<8x128xf32>
    %36 = tpu.matmul %34, %35, %cst_24 {dimension_numbers = #tpu.dot_dimension_numbers<[1], [0], [0], [1], [0, 0, 1, 1], [], []>} : vector<8x128xbf16>, vector<128x128xbf16>, vector<8x128xf32> -> vector<8x128xf32>
    %c0_25 = arith.constant 0 : index
    %c0_26 = arith.constant 0 : index
    %37 = vector.load %arg10[%c0_25, %c0_26] : memref<1x128xf32, #tpu.memory_space<vmem>>, vector<1x128xf32>
    %38 = vector.broadcast %37 : vector<1x128xf32> to vector<8x128xf32>
    %39 = arith.addf %36, %38 : vector<8x128xf32>
    %cst_27 = arith.constant 2.000000e-01 : f32
    %40 = vector.broadcast %cst_27 : f32 to vector<8x128xf32>
    %41 = arith.mulf %40, %39 : vector<8x128xf32>
    %42 = arith.maximumf %39, %41 : vector<8x128xf32>
    %43 = arith.truncf %42 : vector<8x128xf32> to vector<8x128xbf16>
    %c0_28 = arith.constant 0 : index
    %c0_29 = arith.constant 0 : index
    %44 = vector.load %arg11[%c0_28, %c0_29] : memref<128x128xbf16, #tpu.memory_space<vmem>>, vector<128x128xbf16>
    %cst_30 = arith.constant dense<0.000000e+00> : vector<8x128xf32>
    %45 = tpu.matmul %43, %44, %cst_30 {dimension_numbers = #tpu.dot_dimension_numbers<[1], [0], [0], [1], [0, 0, 1, 1], [], []>} : vector<8x128xbf16>, vector<128x128xbf16>, vector<8x128xf32> -> vector<8x128xf32>
    %c0_31 = arith.constant 0 : index
    %c0_32 = arith.constant 0 : index
    %46 = vector.load %arg12[%c0_31, %c0_32] : memref<1x128xf32, #tpu.memory_space<vmem>>, vector<1x128xf32>
    %47 = vector.broadcast %46 : vector<1x128xf32> to vector<8x128xf32>
    %48 = arith.addf %45, %47 : vector<8x128xf32>
    %cst_33 = arith.constant 2.000000e-01 : f32
    %49 = vector.broadcast %cst_33 : f32 to vector<8x128xf32>
    %50 = arith.mulf %49, %48 : vector<8x128xf32>
    %51 = arith.maximumf %48, %50 : vector<8x128xf32>
    %52 = arith.truncf %51 : vector<8x128xf32> to vector<8x128xbf16>
    %c0_34 = arith.constant 0 : index
    %c0_35 = arith.constant 0 : index
    %53 = vector.load %arg13[%c0_34, %c0_35] : memref<128x256xbf16, #tpu.memory_space<vmem>>, vector<128x256xbf16>
    %cst_36 = arith.constant dense<0.000000e+00> : vector<8x256xf32>
    %54 = tpu.matmul %52, %53, %cst_36 {dimension_numbers = #tpu.dot_dimension_numbers<[1], [0], [0], [1], [0, 0, 1, 1], [], []>} : vector<8x128xbf16>, vector<128x256xbf16>, vector<8x256xf32> -> vector<8x256xf32>
    %c0_37 = arith.constant 0 : index
    %c0_38 = arith.constant 0 : index
    %55 = vector.load %arg14[%c0_37, %c0_38] : memref<1x256xf32, #tpu.memory_space<vmem>>, vector<1x256xf32>
    %56 = vector.broadcast %55 : vector<1x256xf32> to vector<8x256xf32>
    %57 = arith.addf %54, %56 : vector<8x256xf32>
    %cst_39 = arith.constant 5.000000e-01 : f32
    %58 = vector.broadcast %cst_39 : f32 to vector<8x256xf32>
    %59 = arith.mulf %58, %57 : vector<8x256xf32>
    %60 = math.tanh %59 : vector<8x256xf32>
    %cst_40 = arith.constant 1.000000e+00 : f32
    %61 = vector.broadcast %cst_40 : f32 to vector<8x256xf32>
    %62 = arith.addf %60, %61 : vector<8x256xf32>
    %cst_41 = arith.constant 5.000000e-01 : f32
    %63 = vector.broadcast %cst_41 : f32 to vector<8x256xf32>
    %64 = arith.mulf %63, %62 : vector<8x256xf32>
    %c0_42 = arith.constant 0 : index
    %c0_43 = arith.constant 0 : index
    %65 = vector.load %arg15[%c0_42, %c0_43] : memref<8x256xf32, #tpu.memory_space<vmem>>, vector<8x256xf32>
    tpu.vector_store %arg15[%c0_42, %c0_43], %64 {strides = array<i32>} : memref<8x256xf32, #tpu.memory_space<vmem>>, vector<8x256xf32>,
    return
  }
  func.func @transform_0(%arg0: i32) -> (i32, i32) {
    %c0_i32 = arith.constant 0 : i32
    %c0_i32_0 = arith.constant 0 : i32
    return %arg0, %c0_i32 : i32, i32
  }
  func.func @transform_1(%arg0: i32) -> (i32, i32) {
    %c0_i32 = arith.constant 0 : i32
    %c0_i32_0 = arith.constant 0 : i32
    return %arg0, %c0_i32 : i32, i32
  }
  func.func @transform_2(%arg0: i32) -> (i32, i32) {
    %c0_i32 = arith.constant 0 : i32
    %c0_i32_0 = arith.constant 0 : i32
    %c0_i32_1 = arith.constant 0 : i32
    return %c0_i32, %c0_i32_0 : i32, i32
  }
  func.func @transform_3(%arg0: i32) -> (i32, i32) {
    %c0_i32 = arith.constant 0 : i32
    %c0_i32_0 = arith.constant 0 : i32
    %c0_i32_1 = arith.constant 0 : i32
    return %c0_i32, %c0_i32_0 : i32, i32
  }
  func.func @transform_4(%arg0: i32) -> (i32, i32) {
    %c0_i32 = arith.constant 0 : i32
    %c0_i32_0 = arith.constant 0 : i32
    %c0_i32_1 = arith.constant 0 : i32
    return %c0_i32, %c0_i32_0 : i32, i32
  }
  func.func @transform_5(%arg0: i32) -> (i32, i32) {
    %c0_i32 = arith.constant 0 : i32
    %c0_i32_0 = arith.constant 0 : i32
    %c0_i32_1 = arith.constant 0 : i32
    return %c0_i32, %c0_i32_0 : i32, i32
  }
  func.func @transform_6(%arg0: i32) -> (i32, i32) {
    %c0_i32 = arith.constant 0 : i32
    %c0_i32_0 = arith.constant 0 : i32
    %c0_i32_1 = arith.constant 0 : i32
    return %c0_i32, %c0_i32_0 : i32, i32
  }
  func.func @transform_7(%arg0: i32) -> (i32, i32) {
    %c0_i32 = arith.constant 0 : i32
    %c0_i32_0 = arith.constant 0 : i32
    %c0_i32_1 = arith.constant 0 : i32
    return %c0_i32, %c0_i32_0 : i32, i32
  }
  func.func @transform_8(%arg0: i32) -> (i32, i32) {
    %c0_i32 = arith.constant 0 : i32
    %c0_i32_0 = arith.constant 0 : i32
    %c0_i32_1 = arith.constant 0 : i32
    return %c0_i32, %c0_i32_0 : i32, i32
  }
  func.func @transform_9(%arg0: i32) -> (i32, i32) {
    %c0_i32 = arith.constant 0 : i32
    %c0_i32_0 = arith.constant 0 : i32
    %c0_i32_1 = arith.constant 0 : i32
    return %c0_i32, %c0_i32_0 : i32, i32
  }
  func.func @transform_10(%arg0: i32) -> (i32, i32) {
    %c0_i32 = arith.constant 0 : i32
    %c0_i32_0 = arith.constant 0 : i32
    %c0_i32_1 = arith.constant 0 : i32
    return %c0_i32, %c0_i32_0 : i32, i32
  }
  func.func @transform_11(%arg0: i32) -> (i32, i32) {
    %c0_i32 = arith.constant 0 : i32
    %c0_i32_0 = arith.constant 0 : i32
    %c0_i32_1 = arith.constant 0 : i32
    return %c0_i32, %c0_i32_0 : i32, i32
  }
  func.func @transform_12(%arg0: i32) -> (i32, i32) {
    %c0_i32 = arith.constant 0 : i32
    %c0_i32_0 = arith.constant 0 : i32
    %c0_i32_1 = arith.constant 0 : i32
    return %c0_i32, %c0_i32_0 : i32, i32
  }
  func.func @transform_13(%arg0: i32) -> (i32, i32) {
    %c0_i32 = arith.constant 0 : i32
    %c0_i32_0 = arith.constant 0 : i32
    %c0_i32_1 = arith.constant 0 : i32
    return %c0_i32, %c0_i32_0 : i32, i32
  }
  func.func @transform_14(%arg0: i32) -> (i32, i32) {
    %c0_i32 = arith.constant 0 : i32
    %c0_i32_0 = arith.constant 0 : i32
    return %arg0, %c0_i32 : i32, i32
  }
  func.func @transform_15(%arg0: i32) -> (i32, i32) {
    %c0_i32 = arith.constant 0 : i32
    %c0_i32_0 = arith.constant 0 : i32
    return %arg0, %c0_i32 : i32, i32
  }
}

module attributes {stable_mosaic.version = 11 : i64} {
  func.func @vae_kernel(%arg0: i32, %arg1: memref<8x256xf32, #tpu.memory_space<vmem>>, %arg2: memref<8x128xf32, #tpu.memory_space<vmem>>, %arg3: memref<256x128xbf16, #tpu.memory_space<vmem>>, %arg4: memref<1x128xf32, #tpu.memory_space<vmem>>, %arg5: memref<128x128xbf16, #tpu.memory_space<vmem>>, %arg6: memref<1x128xf32, #tpu.memory_space<vmem>>, %arg7: memref<128x256xbf16, #tpu.memory_space<vmem>>, %arg8: memref<1x256xf32, #tpu.memory_space<vmem>>, %arg9: memref<128x128xbf16, #tpu.memory_space<vmem>>, %arg10: memref<1x128xf32, #tpu.memory_space<vmem>>, %arg11: memref<128x128xbf16, #tpu.memory_space<vmem>>, %arg12: memref<1x128xf32, #tpu.memory_space<vmem>>, %arg13: memref<128x256xbf16, #tpu.memory_space<vmem>>, %arg14: memref<1x256xf32, #tpu.memory_space<vmem>>, %arg15: memref<8x256xf32, #tpu.memory_space<vmem>>, %arg16: memref<8x256xf32, #tpu.memory_space<vmem>>) attributes {dimension_semantics = [#tpu.dimension_semantics<parallel>], iteration_bounds = array<i64: 2>, scalar_prefetch = 0 : i64, scratch_operands = 0 : i64, tpu.core_type = #tpu.core_type<tc>, window_params = [{transform_indices = @transform_0, window_bounds = array<i64: 8, 256>}, {transform_indices = @transform_1, window_bounds = array<i64: 8, 128>}, {pipeline_mode = #tpu.pipeline_mode<synchronous>, transform_indices = @transform_2, window_bounds = array<i64: 256, 128>}, {pipeline_mode = #tpu.pipeline_mode<synchronous>, transform_indices = @transform_3, window_bounds = array<i64: 1, 128>}, {pipeline_mode = #tpu.pipeline_mode<synchronous>, transform_indices = @transform_4, window_bounds = array<i64: 128, 128>}, {pipeline_mode = #tpu.pipeline_mode<synchronous>, transform_indices = @transform_5, window_bounds = array<i64: 1, 128>}, {pipeline_mode = #tpu.pipeline_mode<synchronous>, transform_indices = @transform_6, window_bounds = array<i64: 128, 256>}, {pipeline_mode = #tpu.pipeline_mode<synchronous>, transform_indices = @transform_7, window_bounds = array<i64: 1, 256>}, {pipeline_mode = #tpu.pipeline_mode<synchronous>, transform_indices = @transform_8, window_bounds = array<i64: 128, 128>}, {pipeline_mode = #tpu.pipeline_mode<synchronous>, transform_indices = @transform_9, window_bounds = array<i64: 1, 128>}, {pipeline_mode = #tpu.pipeline_mode<synchronous>, transform_indices = @transform_10, window_bounds = array<i64: 128, 128>}, {pipeline_mode = #tpu.pipeline_mode<synchronous>, transform_indices = @transform_11, window_bounds = array<i64: 1, 128>}, {pipeline_mode = #tpu.pipeline_mode<synchronous>, transform_indices = @transform_12, window_bounds = array<i64: 128, 256>}, {pipeline_mode = #tpu.pipeline_mode<synchronous>, transform_indices = @transform_13, window_bounds = array<i64: 1, 256>}, {transform_indices = @transform_14, window_bounds = array<i64: 8, 256>}, {transform_indices = @transform_15, window_bounds = array<i64: 8, 256>}]} {
    %c0 = arith.constant 0 : index
    %c0_0 = arith.constant 0 : index
    %0 = vector.load %arg1[%c0, %c0_0] : memref<8x256xf32, #tpu.memory_space<vmem>>, vector<8x256xf32>
    %1 = arith.truncf %0 : vector<8x256xf32> to vector<8x256xbf16>
    %c0_1 = arith.constant 0 : index
    %c0_2 = arith.constant 0 : index
    %2 = vector.load %arg3[%c0_1, %c0_2] : memref<256x128xbf16, #tpu.memory_space<vmem>>, vector<256x128xbf16>
    %cst = arith.constant dense<0.000000e+00> : vector<8x128xf32>
    %3 = tpu.matmul %1, %2, %cst {dimension_numbers = #tpu.dot_dimension_numbers<[1], [0], [0], [1], [0, 0, 1, 1], [], []>} : vector<8x256xbf16>, vector<256x128xbf16>, vector<8x128xf32> -> vector<8x128xf32>
    %c0_3 = arith.constant 0 : index
    %c0_4 = arith.constant 0 : index
    %4 = vector.load %arg4[%c0_3, %c0_4] : memref<1x128xf32, #tpu.memory_space<vmem>>, vector<1x128xf32>
    %5 = vector.broadcast %4 : vector<1x128xf32> to vector<8x128xf32>
    %6 = arith.addf %3, %5 : vector<8x128xf32>
    %cst_5 = arith.constant 2.000000e-01 : f32
    %7 = vector.broadcast %cst_5 : f32 to vector<8x128xf32>
    %8 = arith.mulf %7, %6 : vector<8x128xf32>
    %9 = arith.maximumf %6, %8 : vector<8x128xf32>
    %10 = arith.truncf %9 : vector<8x128xf32> to vector<8x128xbf16>
    %c0_6 = arith.constant 0 : index
    %c0_7 = arith.constant 0 : index
    %11 = vector.load %arg5[%c0_6, %c0_7] : memref<128x128xbf16, #tpu.memory_space<vmem>>, vector<128x128xbf16>
    %cst_8 = arith.constant dense<0.000000e+00> : vector<8x128xf32>
    %12 = tpu.matmul %10, %11, %cst_8 {dimension_numbers = #tpu.dot_dimension_numbers<[1], [0], [0], [1], [0, 0, 1, 1], [], []>} : vector<8x128xbf16>, vector<128x128xbf16>, vector<8x128xf32> -> vector<8x128xf32>
    %c0_9 = arith.constant 0 : index
    %c0_10 = arith.constant 0 : index
    %13 = vector.load %arg6[%c0_9, %c0_10] : memref<1x128xf32, #tpu.memory_space<vmem>>, vector<1x128xf32>
    %14 = vector.broadcast %13 : vector<1x128xf32> to vector<8x128xf32>
    %15 = arith.addf %12, %14 : vector<8x128xf32>
    %cst_11 = arith.constant 2.000000e-01 : f32
    %16 = vector.broadcast %cst_11 : f32 to vector<8x128xf32>
    %17 = arith.mulf %16, %15 : vector<8x128xf32>
    %18 = arith.maximumf %15, %17 : vector<8x128xf32>
    %19 = arith.truncf %18 : vector<8x128xf32> to vector<8x128xbf16>
    %c0_12 = arith.constant 0 : index
    %c0_13 = arith.constant 0 : index
    %20 = vector.load %arg7[%c0_12, %c0_13] : memref<128x256xbf16, #tpu.memory_space<vmem>>, vector<128x256xbf16>
    %cst_14 = arith.constant dense<0.000000e+00> : vector<8x256xf32>
    %21 = tpu.matmul %19, %20, %cst_14 {dimension_numbers = #tpu.dot_dimension_numbers<[1], [0], [0], [1], [0, 0, 1, 1], [], []>} : vector<8x128xbf16>, vector<128x256xbf16>, vector<8x256xf32> -> vector<8x256xf32>
    %c0_15 = arith.constant 0 : index
    %c0_16 = arith.constant 0 : index
    %22 = vector.load %arg8[%c0_15, %c0_16] : memref<1x256xf32, #tpu.memory_space<vmem>>, vector<1x256xf32>
    %23 = vector.broadcast %22 : vector<1x256xf32> to vector<8x256xf32>
    %24 = arith.addf %21, %23 : vector<8x256xf32>
    %c0_17 = arith.constant 0 : index
    %c0_18 = arith.constant 0 : index
    %25 = vector.load %arg16[%c0_17, %c0_18] : memref<8x256xf32, #tpu.memory_space<vmem>>, vector<8x256xf32>
    tpu.vector_store %arg16[%c0_17, %c0_18], %24 {strides = array<i32>} : memref<8x256xf32, #tpu.memory_space<vmem>>, vector<8x256xf32>,
    %26 = vector.extract_strided_slice %24 {offsets = [0, 0], sizes = [8, 128], strides = [1, 1]} : vector<8x256xf32> to vector<8x128xf32>
    %27 = vector.extract_strided_slice %24 {offsets = [0, 128], sizes = [8, 128], strides = [1, 1]} : vector<8x256xf32> to vector<8x128xf32>
    %cst_19 = arith.constant 5.000000e-01 : f32
    %28 = vector.broadcast %cst_19 : f32 to vector<8x128xf32>
    %29 = arith.mulf %28, %27 : vector<8x128xf32>
    %30 = math.exp %29 : vector<8x128xf32>
    %c0_20 = arith.constant 0 : index
    %c0_21 = arith.constant 0 : index
    %31 = vector.load %arg2[%c0_20, %c0_21] : memref<8x128xf32, #tpu.memory_space<vmem>>, vector<8x128xf32>
    %32 = arith.mulf %30, %31 : vector<8x128xf32>
    %33 = arith.addf %26, %32 : vector<8x128xf32>
    %34 = arith.truncf %33 : vector<8x128xf32> to vector<8x128xbf16>
    %c0_22 = arith.constant 0 : index
    %c0_23 = arith.constant 0 : index
    %35 = vector.load %arg9[%c0_22, %c0_23] : memref<128x128xbf16, #tpu.memory_space<vmem>>, vector<128x128xbf16>
    %cst_24 = arith.constant dense<0.000000e+00> : vector<8x128xf32>
    %36 = tpu.matmul %34, %35, %cst_24 {dimension_numbers = #tpu.dot_dimension_numbers<[1], [0], [0], [1], [0, 0, 1, 1], [], []>} : vector<8x128xbf16>, vector<128x128xbf16>, vector<8x128xf32> -> vector<8x128xf32>
    %c0_25 = arith.constant 0 : index
    %c0_26 = arith.constant 0 : index
    %37 = vector.load %arg10[%c0_25, %c0_26] : memref<1x128xf32, #tpu.memory_space<vmem>>, vector<1x128xf32>
    %38 = vector.broadcast %37 : vector<1x128xf32> to vector<8x128xf32>
    %39 = arith.addf %36, %38 : vector<8x128xf32>
    %cst_27 = arith.constant 2.000000e-01 : f32
    %40 = vector.broadcast %cst_27 : f32 to vector<8x128xf32>
    %41 = arith.mulf %40, %39 : vector<8x128xf32>
    %42 = arith.maximumf %39, %41 : vector<8x128xf32>
    %43 = arith.truncf %42 : vector<8x128xf32> to vector<8x128xbf16>
    %c0_28 = arith.constant 0 : index
    %c0_29 = arith.constant 0 : index
    %44 = vector.load %arg11[%c0_28, %c0_29] : memref<128x128xbf16, #tpu.memory_space<vmem>>, vector<128x128xbf16>
    %cst_30 = arith.constant dense<0.000000e+00> : vector<8x128xf32>
    %45 = tpu.matmul %43, %44, %cst_30 {dimension_numbers = #tpu.dot_dimension_numbers<[1], [0], [0], [1], [0, 0, 1, 1], [], []>} : vector<8x128xbf16>, vector<128x128xbf16>, vector<8x128xf32> -> vector<8x128xf32>
    %c0_31 = arith.constant 0 : index
    %c0_32 = arith.constant 0 : index
    %46 = vector.load %arg12[%c0_31, %c0_32] : memref<1x128xf32, #tpu.memory_space<vmem>>, vector<1x128xf32>
    %47 = vector.broadcast %46 : vector<1x128xf32> to vector<8x128xf32>
    %48 = arith.addf %45, %47 : vector<8x128xf32>
    %cst_33 = arith.constant 2.000000e-01 : f32
    %49 = vector.broadcast %cst_33 : f32 to vector<8x128xf32>
    %50 = arith.mulf %49, %48 : vector<8x128xf32>
    %51 = arith.maximumf %48, %50 : vector<8x128xf32>
    %52 = arith.truncf %51 : vector<8x128xf32> to vector<8x128xbf16>
    %c0_34 = arith.constant 0 : index
    %c0_35 = arith.constant 0 : index
    %53 = vector.load %arg13[%c0_34, %c0_35] : memref<128x256xbf16, #tpu.memory_space<vmem>>, vector<128x256xbf16>
    %cst_36 = arith.constant dense<0.000000e+00> : vector<8x256xf32>
    %54 = tpu.matmul %52, %53, %cst_36 {dimension_numbers = #tpu.dot_dimension_numbers<[1], [0], [0], [1], [0, 0, 1, 1], [], []>} : vector<8x128xbf16>, vector<128x256xbf16>, vector<8x256xf32> -> vector<8x256xf32>
    %c0_37 = arith.constant 0 : index
    %c0_38 = arith.constant 0 : index
    %55 = vector.load %arg14[%c0_37, %c0_38] : memref<1x256xf32, #tpu.memory_space<vmem>>, vector<1x256xf32>
    %56 = vector.broadcast %55 : vector<1x256xf32> to vector<8x256xf32>
    %57 = arith.addf %54, %56 : vector<8x256xf32>
    %cst_39 = arith.constant 5.000000e-01 : f32
    %58 = vector.broadcast %cst_39 : f32 to vector<8x256xf32>
    %59 = arith.mulf %58, %57 : vector<8x256xf32>
    %60 = math.tanh %59 : vector<8x256xf32>
    %cst_40 = arith.constant 1.000000e+00 : f32
    %61 = vector.broadcast %cst_40 : f32 to vector<8x256xf32>
    %62 = arith.addf %60, %61 : vector<8x256xf32>
    %cst_41 = arith.constant 5.000000e-01 : f32
    %63 = vector.broadcast %cst_41 : f32 to vector<8x256xf32>
    %64 = arith.mulf %63, %62 : vector<8x256xf32>
    %c0_42 = arith.constant 0 : index
    %c0_43 = arith.constant 0 : index
    %65 = vector.load %arg15[%c0_42, %c0_43] : memref<8x256xf32, #tpu.memory_space<vmem>>, vector<8x256xf32>
    tpu.vector_store %arg15[%c0_42, %c0_43], %64 {strides = array<i32>} : memref<8x256xf32, #tpu.memory_space<vmem>>, vector<8x256xf32>,
    return
  }
  func.func @transform_0(%arg0: i32) -> (i32, i32) {
    %c0_i32 = arith.constant 0 : i32
    %c0_i32_0 = arith.constant 0 : i32
    return %arg0, %c0_i32 : i32, i32
  }
  func.func @transform_1(%arg0: i32) -> (i32, i32) {
    %c0_i32 = arith.constant 0 : i32
    %c0_i32_0 = arith.constant 0 : i32
    return %arg0, %c0_i32 : i32, i32
  }
  func.func @transform_2(%arg0: i32) -> (i32, i32) {
    %c0_i32 = arith.constant 0 : i32
    %c0_i32_0 = arith.constant 0 : i32
    %c0_i32_1 = arith.constant 0 : i32
    return %c0_i32, %c0_i32_0 : i32, i32
  }
  func.func @transform_3(%arg0: i32) -> (i32, i32) {
    %c0_i32 = arith.constant 0 : i32
    %c0_i32_0 = arith.constant 0 : i32
    %c0_i32_1 = arith.constant 0 : i32
    return %c0_i32, %c0_i32_0 : i32, i32
  }
  func.func @transform_4(%arg0: i32) -> (i32, i32) {
    %c0_i32 = arith.constant 0 : i32
    %c0_i32_0 = arith.constant 0 : i32
    %c0_i32_1 = arith.constant 0 : i32
    return %c0_i32, %c0_i32_0 : i32, i32
  }
  func.func @transform_5(%arg0: i32) -> (i32, i32) {
    %c0_i32 = arith.constant 0 : i32
    %c0_i32_0 = arith.constant 0 : i32
    %c0_i32_1 = arith.constant 0 : i32
    return %c0_i32, %c0_i32_0 : i32, i32
  }
  func.func @transform_6(%arg0: i32) -> (i32, i32) {
    %c0_i32 = arith.constant 0 : i32
    %c0_i32_0 = arith.constant 0 : i32
    %c0_i32_1 = arith.constant 0 : i32
    return %c0_i32, %c0_i32_0 : i32, i32
  }
  func.func @transform_7(%arg0: i32) -> (i32, i32) {
    %c0_i32 = arith.constant 0 : i32
    %c0_i32_0 = arith.constant 0 : i32
    %c0_i32_1 = arith.constant 0 : i32
    return %c0_i32, %c0_i32_0 : i32, i32
  }
  func.func @transform_8(%arg0: i32) -> (i32, i32) {
    %c0_i32 = arith.constant 0 : i32
    %c0_i32_0 = arith.constant 0 : i32
    %c0_i32_1 = arith.constant 0 : i32
    return %c0_i32, %c0_i32_0 : i32, i32
  }
  func.func @transform_9(%arg0: i32) -> (i32, i32) {
    %c0_i32 = arith.constant 0 : i32
    %c0_i32_0 = arith.constant 0 : i32
    %c0_i32_1 = arith.constant 0 : i32
    return %c0_i32, %c0_i32_0 : i32, i32
  }
  func.func @transform_10(%arg0: i32) -> (i32, i32) {
    %c0_i32 = arith.constant 0 : i32
    %c0_i32_0 = arith.constant 0 : i32
    %c0_i32_1 = arith.constant 0 : i32
    return %c0_i32, %c0_i32_0 : i32, i32
  }
  func.func @transform_11(%arg0: i32) -> (i32, i32) {
    %c0_i32 = arith.constant 0 : i32
    %c0_i32_0 = arith.constant 0 : i32
    %c0_i32_1 = arith.constant 0 : i32
    return %c0_i32, %c0_i32_0 : i32, i32
  }
  func.func @transform_12(%arg0: i32) -> (i32, i32) {
    %c0_i32 = arith.constant 0 : i32
    %c0_i32_0 = arith.constant 0 : i32
    %c0_i32_1 = arith.constant 0 : i32
    return %c0_i32, %c0_i32_0 : i32, i32
  }
  func.func @transform_13(%arg0: i32) -> (i32, i32) {
    %c0_i32 = arith.constant 0 : i32
    %c0_i32_0 = arith.constant 0 : i32
    %c0_i32_1 = arith.constant 0 : i32
    return %c0_i32, %c0_i32_0 : i32, i32
  }
  func.func @transform_14(%arg0: i32) -> (i32, i32) {
    %c0_i32 = arith.constant 0 : i32
    %c0_i32_0 = arith.constant 0 : i32
    return %arg0, %c0_i32 : i32, i32
  }
  func.func @transform_15(%arg0: i32) -> (i32, i32) {
    %c0_i32 = arith.constant 0 : i32
    %c0_i32_0 = arith.constant 0 : i32
    return %arg0, %c0_i32 : i32, i32
  }
}

</mosaic_0001>

<bundles_post_ra>
// kernel: tpu_custom_call.1
= control target key start
LH: loop header
LB: loop body
LE: loop exit
PB: predicated region body
PF: predicated region fallthrough
CT: control target
= control target key end

     0   :  { %s2962_s0 = inlined_call_operand.hbm [shape: f32[16,256], index: 0, kind: input, shape index: {}]   ;;  %s2963_s1 = inlined_call_operand.hbm [shape: f32[16,128], index: 1, kind: input, shape index: {}]   ;;  %s2964_s2 = inlined_call_operand.hbm [shape: bf16[256,128], index: 2, kind: input, shape index: {}]   ;;  %s2965_s3 = inlined_call_operand.vmem [shape: f32[1,128], index: 3, kind: input, shape index: {}]   ;;  %s2966_s4 = inlined_call_operand.hbm [shape: bf16[128,128], index: 4, kind: input, shape index: {}]   ;;  %s2967_s5 = inlined_call_operand.vmem [shape: f32[1,128], index: 5, kind: input, shape index: {}]   ;;  %s2968_s6 = inlined_call_operand.hbm [shape: bf16[128,256], index: 6, kind: input, shape index: {}]   ;;  %s2969_s7 = inlined_call_operand.vmem [shape: f32[1,256], index: 7, kind: input, shape index: {}]   ;;  %s2970_s8 = inlined_call_operand.hbm [shape: bf16[128,128], index: 8, kind: input, shape index: {}]   ;;  %s2971_s9 = inlined_call_operand.vmem [shape: f32[1,128], index: 9, kind: input, shape index: {}]   ;;  %s2972_s10 = inlined_call_operand.hbm [shape: bf16[128,128], index: 10, kind: input, shape index: {}]   ;;  %s2973_s11 = inlined_call_operand.vmem [shape: f32[1,128], index: 11, kind: input, shape index: {}]   ;;  %s2974_s12 = inlined_call_operand.hbm [shape: bf16[128,256], index: 12, kind: input, shape index: {}]   ;;  %s2975_s13 = inlined_call_operand.vmem [shape: f32[1,256], index: 13, kind: input, shape index: {}]   ;;  %s2976_s14 = inlined_call_operand.hbm [shape: f32[16,256], index: 14, kind: output, shape index: {0}]   ;;  %s2977_s15 = inlined_call_operand.hbm [shape: f32[16,256], index: 15, kind: output, shape index: {1}]  }
   0x1   :  { %2986 = sst [smem:[#allocation29_spill]] %s2962_s0 }
   0x2   :  { %2987 = sst [smem:[#allocation30_spill]] %s2964_s2 }
   0x3   :  { %2988 = sst [smem:[#allocation31_spill]] %s2966_s4 }
   0x4   :  { %2989 = sst [smem:[#allocation32_spill]] %s2968_s6 }
   0x5   :  { %2990 = sst [smem:[#allocation33_spill]] %s2970_s8 }
   0x6   :  { %2991 = sst [smem:[#allocation34_spill]] %s2972_s10 }
   0x7   :  { %2992 = sst [smem:[#allocation35_spill]] %s2974_s12 }
   0x8   :  { %2993 = sst [smem:[#allocation36_spill]] %s2975_s13 }
   0x9   :  { %2994 = sst [smem:[#allocation37_spill]] %s2976_s14 }
   0xa   :  { %21 = vsyncpa [#allocation3], 0 }
   0xb   :  { %23 = vsyncpa [#allocation3 + $0x1], 0 }
   0xc   :  { %24 = vsyncpa [#allocation6], 0 }
   0xd   :  { %26 = vsyncpa [#allocation6 + $0x1], 0 }
   0xe   :  { %27 = vsyncpa [#allocation9], 0 }
   0xf   :  { %28 = vsyncpa [#allocation12], 0 }
  0x10   :  { %29 = vsyncpa [#allocation15], 0 }
  0x11   :  { %30 = vsyncpa [#allocation4], 0 }
  0x12   :  { %32 = vsyncpa [#allocation4 + $0x1], 0 }
  0x13   :  { %33 = vsyncpa [#allocation18], 0 }
  0x14   :  { %35 = vsyncpa [#allocation18 + $0x1], 0  ;;  %s2568_s18 = smov 0   ;;  %s2570_s19 = smov 0  }
  0x15   :  { %s2572_s20 = smov 0   ;;  %s2574_s21 = smov 0  }
  0x16 LB: > { %2995 = sst [smem:[#allocation27_spill]] %s2465_s20  ;;  %s2471_s22 = smov [#allocation7]   ;;  %s2469_s21 = sphi %s2574_s21, %s3035_s21   ;;  %s2465_s20 = sphi %s2572_s20, %s3032_s20   ;;  %s2461_s19 = sphi %s2570_s19, %s3034_s19   ;;  %s2457_s18 = sphi %s2568_s18, %s3033_s18  }
  0x17   : > { %s414_s23 = sshll.u32 %s2471_s22, 4  ;;  %s2589_s24 = sadd.s32 4294967295, %s2469_s21   ;;  %s415_s23 = int_to_ptr.vmem [resolvable:$true] %s414_s23 }
  0x18   : > { %p1705_p0 = scmp.ge.s32.totalorder %s2469_s21, 1  ;;  %p2981_p1 = scmp.eq.s32.totalorder %s2589_s24, 0 }
  0x19   : > { %p402_p2 = scmp.lt.s32.totalorder %s2469_s21, 3  ;;  %s2472_s26 = smov [#allocation8]  }
  0x1a   : > { %s430_s27 = sshll.u32 %s2472_s26, 4  ;;  %s2473_s29 = smov [#allocation11]   ;;  %s2607_s27 = int_to_ptr.vmem [resolvable:$true] %s430_s27 }
  0x1b   : > { %p2594_p3 = pnand %p1705_p0, %p402_p2  ;;  %s462_s30 = sshll.u32 %s2473_s29, 4  ;;  %s2609_s30 = int_to_ptr.vmem [resolvable:$true] %s462_s30 }
  0x1c   : > { %s2154_s17 = scalar_lea.vmem %s415_s23, 2048  ;;  %p2162_p11 = scmp.lt.s32.totalorder %s415_s23, %s415_s23 }
  0x1d   : > { %s2996_s25 = scalar_select %p2594_p3, 1, 0 }
  0x1e   : > { %p1957_p5 = pneg %p2594_p3  ;;  %p2155_p8 = scmp.ne.s32.totalorder %s415_s23, %s2154_s17 }
  0x1f   : > { %p2163_p12 = scmp.lt.s32.totalorder %s2154_s17, %s2154_s17 }
  0x20   : > { %p2603_p6 = pnand %p1957_p5, %p2981_p1 }
  0x21   : > { %p2164_p13 = por %p2163_p12, %p2162_p11 }
  0x22   : > { %p2613_p7 = pneg %p2603_p6 }
  0x24   : > { %p2157_p9 = pnand %p2155_p8, %p2613_p7 }
  0x26   : > { %p2158_p10 = pneg %p2157_p9 }
  0x28   : > { %p2165_p0 = pnand %p2164_p13, %p2158_p10 }
  0x2a   : > { %2168 = shalt.err (!%p2165_p0)
}
  0x2b   : > { %s2979_s22 = smov 64   ;;  %s2980_s26 = smov 4  }
  0x2c   : > { %s2999_s2 = sld [smem:[#allocation30_spill]]  ;;  %s2180_s13 = scalar_lea.vmem %s2607_s27, 1024 }
  0x2d   : > { %p2181_p2 = scmp.ne.s32.totalorder %s2607_s27, %s2180_s13  ;;  %p2188_p9 = scmp.lt.s32.totalorder %s2607_s27, %s2607_s27 }
  0x2e   : > { %p2189_p10 = scmp.lt.s32.totalorder %s2180_s13, %s2180_s13 }
  0x2f   : > { %p2183_p5 = pnand %p2181_p2, %p2613_p7 }
  0x30   : > { %p2190_p11 = por %p2189_p10, %p2188_p9 }
  0x31   : > { %p2184_p8 = pneg %p2183_p5 }
  0x32   : > { %1960 = dma.hbm_to_vmem [thread:$0]  (!%p2603_p6), %s2999_s2, 2048, %s415_s23, [#allocation6], %s2979_s22, %s2979_s22, %s2980_s26  }
  0x33   : > { %p2191_p12 = pnand %p2190_p11, %p2184_p8 }
  0x35   : > { %2194 = shalt.err (!%p2191_p12)
}
  0x36   : > { %s3000_s4 = sld [smem:[#allocation31_spill]]  ;;  %s2206_s23 = scalar_lea.vmem %s2609_s30, 1024 }
  0x37   : > { %p2207_p13 = scmp.ne.s32.totalorder %s2609_s30, %s2206_s23  ;;  %p2214_p5 = scmp.lt.s32.totalorder %s2609_s30, %s2609_s30 }
  0x38   : > { %p2215_p8 = scmp.lt.s32.totalorder %s2206_s23, %s2206_s23 }
  0x39   : > { %p2209_p0 = pnand %p2207_p13, %p2613_p7 }
  0x3a   : > { %p2216_p9 = por %p2215_p8, %p2214_p5 }
  0x3b   : > { %p2210_p2 = pneg %p2209_p0 }
  0x3c   : > { %1963 = dma.hbm_to_vmem [thread:$0]  (!%p2603_p6), %s3000_s4, 1024, %s2607_s27, [#allocation9], %s2979_s22, %s2979_s22, %s2980_s26  }
  0x3d   : > { %p2217_p10 = pnand %p2216_p9, %p2210_p2 }
  0x3f   : > { %2220 = shalt.err (!%p2217_p10)
}
  0x40   : > { %s3001_s8 = sld [smem:[#allocation33_spill]]  ;;  %s2476_s27 = smov [#allocation10]  }
  0x41   : > { %s446_s17 = sshll.u32 %s2476_s27, 4  ;;  %s447_s17 = int_to_ptr.vmem [resolvable:$true] %s446_s17 }
  0x42   : > { %s2232_s14 = scalar_lea.vmem %s447_s17, 2048  ;;  %p2240_p0 = scmp.lt.s32.totalorder %s447_s17, %s447_s17 }
  0x43   : > { %p2233_p11 = scmp.ne.s32.totalorder %s447_s17, %s2232_s14  ;;  %p2241_p2 = scmp.lt.s32.totalorder %s2232_s14, %s2232_s14 }
  0x45   : > { %p2235_p12 = pnand %p2233_p11, %p2613_p7  ;;  %p2242_p5 = por %p2241_p2, %p2240_p0 }
  0x46   : > { %1969 = dma.hbm_to_vmem [thread:$0]  (!%p2603_p6), %s3001_s8, 1024, %s2609_s30, [#allocation12], %s2979_s22, %s2979_s22, %s2980_s26  }
  0x47   : > { %p2236_p13 = pneg %p2235_p12 }
  0x49   : > { %p2243_p8 = pnand %p2242_p5, %p2236_p13 }
  0x4b   : > { %2246 = shalt.err (!%p2243_p8)
}
  0x4c   : > { %s2477_s23 = smov 128   ;;  %s2478_s2 = smov 8  }
  0x4d   : > { %s3002_s6 = sld [smem:[#allocation32_spill]]  ;;  %s2479_s29 = smov [#allocation13]  }
  0x4e   : > { %s478_s27 = sshll.u32 %s2479_s29, 4  ;;  %s2480_s22 = smov [#allocation14]   ;;  %s479_s27 = int_to_ptr.vmem [resolvable:$true] %s478_s27 }
  0x4f   : > { %s494_s26 = sshll.u32 %s2480_s22, 4  ;;  %s2258_s14 = scalar_lea.vmem %s479_s27, 1024  ;;  %s495_s26 = int_to_ptr.vmem [resolvable:$true] %s494_s26 }
  0x50   : > { %p2259_p9 = scmp.ne.s32.totalorder %s479_s27, %s2258_s14  ;;  %p2266_p12 = scmp.lt.s32.totalorder %s479_s27, %s479_s27 }
  0x51   : > { %p2267_p13 = scmp.lt.s32.totalorder %s2258_s14, %s2258_s14 }
  0x52   : > { %p2261_p10 = pnand %p2259_p9, %p2613_p7 }
  0x53   : > { %1966 = dma.hbm_to_vmem [thread:$0]  (!%p2603_p6), %s3002_s6, 2048, %s447_s17, [#allocation9], %s2477_s23, %s2477_s23, %s2478_s2  }
  0x54   : > { %p2262_p11 = pneg %p2261_p10  ;;  %p2268_p0 = por %p2267_p13, %p2266_p12 }
  0x56   : > { %p2269_p2 = pnand %p2268_p0, %p2262_p11 }
  0x58   : > { %2272 = shalt.err (!%p2269_p2)
}
  0x59   : > { %s3003_s30 = smov 4   ;;  %s3004_s17 = smov 64  }
  0x5a   : > { %s3005_s10 = sld [smem:[#allocation34_spill]]  ;;  %s2284_s22 = scalar_lea.vmem %s495_s26, 2048 }
  0x5b   : > { %p2285_p5 = scmp.ne.s32.totalorder %s495_s26, %s2284_s22  ;;  %p2292_p10 = scmp.lt.s32.totalorder %s495_s26, %s495_s26 }
  0x5c   : > { %p2293_p4 = scmp.lt.s32.totalorder %s2284_s22, %s2284_s22 }
  0x5d   : > { %p2287_p8 = pnand %p2285_p5, %p2613_p7 }
  0x5e   : > { %p2294_p12 = por %p2293_p4, %p2292_p10 }
  0x5f   : > { %p2288_p9 = pneg %p2287_p8 }
  0x60   : > { %1972 = dma.hbm_to_vmem [thread:$0]  (!%p2603_p6), %s3005_s10, 1024, %s479_s27, [#allocation12], %s3004_s17, %s3004_s17, %s3003_s30  }
  0x61   : > { %p2295_p11 = pnand %p2294_p12, %p2288_p9 }
  0x63   : > { %2298 = shalt.err (!%p2295_p11)
}
  0x64   : > { %s3006_s12 = sld [smem:[#allocation35_spill]]  ;;  %s1704_s28 = sadd.s32 4294967294, %s2469_s21  }
  0x65   : > { %s2689_s16 = sadd.s32 1, %s2469_s21   ;;  %s48_s27 = sadd.s32 1, %s2465_s20 }
  0x66   : > { %s45_s4 = ssub.s32 %s2469_s21, %s2689_s16  ;;  %p55_p7 = scmp.ne.s32.totalorder %s2465_s20, %s2461_s19 }
  0x67   : > { %p46_p4 = scmp.eq.s32.totalorder %s45_s4, 0  ;;  %p56_p13 = scmp.eq.s32.totalorder %s2469_s21, 0 }
  0x68   : > { %p61_p0 = scmp.ne.s32.totalorder %s2461_s19, %s2457_s18  ;;  %p363_p5 = scmp.eq.s32.totalorder %s2589_s24, 1 }
  0x69   : > { %s2700_s30 = scalar_select %p46_p4, %s2465_s20, %s48_s27  }
  0x6a   : > { %1975 = dma.hbm_to_vmem [thread:$0]  (!%p2603_p6), %s3006_s12, 2048, %s495_s26, [#allocation15], %s2477_s23, %s2477_s23, %s2478_s2  }
  0x6b   : > { %3007 = sst [smem:[#allocation28_spill]] %s2700_s30  ;;  %p2702_p2 = por %p56_p13, %p55_p7 }
  0x6c   : > { %p2708_p6 = por %p2981_p1, %p61_p0  ;;  %p369_p8 = scmp.eq.s32.totalorder %s1704_s28, 1 }
  0x6d   : > { %p1996_p9 = scmp.lt.s32.totalorder %s2469_s21, 2  ;;  %s2715_s26 = sand.u32 1, %s2465_s20  }
  0x6e   : > { %s3009_s2 = scalar_select %p2708_p6, 1, 0 }
  0x6f   : > { %p2717_p10 = por %p363_p5, %p55_p7  ;;  %p2721_p12 = por %p369_p8, %p61_p0 }
  0x70   : > { %s1713_s29 = sshll.u32 %s2715_s26, 4  ;;  %s1813_s22 = sshll.u32 %s2469_s21, 8 }
  0x71   : > { %s3010_s23 = scalar_select %p2717_p10, 1, 0 }
  0x72   : > { %s3011_s13 = scalar_select %p2721_p12, 1, 0 }
  0x73   : > { %s3012_s0 = sld [smem:[#allocation29_spill]]  ;;  %s515_s27 = scalar_lea.vmem [#allocation2], %s1713_s29 }
  0x74   : > { %s523_s6 = sshll.u32 %s515_s27, 4  ;;  %p2736_p11 = pnand %p1996_p9, %p2702_p2  ;;  %s2732_s6 = int_to_ptr.vmem [resolvable:$true] %s523_s6 }
  0x75   : > { %s512_s30 = scalar_lea.sflag [#allocation3], %s2715_s26 }
  0x76   : > { %p2301_p7 = pneg %p2736_p11 }
  0x79   : > { %s2730_s28 = scalar_lea.hbm %s3012_s0, %s1813_s22  ;;  %s2304_s17 = scalar_lea.hbm %s3012_s0, 512 }
  0x7a   : > { %s2299_s14 = scalar_lea.hbm %s2730_s28, 256  ;;  %p2305_p2 = scmp.lt.s32.totalorder %s2730_s28, %s3012_s0 }
  0x7b   : > { %p2300_p4 = scmp.ne.s32.totalorder %s2730_s28, %s2299_s14  ;;  %p2306_p5 = scmp.lt.s32.totalorder %s2304_s17, %s2299_s14 }
  0x7d   : > { %p2302_p13 = pnand %p2301_p7, %p2300_p4  ;;  %p2307_p8 = por %p2306_p5, %p2305_p2 }
  0x7f   : > { %p2303_p0 = pneg %p2302_p13 }
  0x81   : > { %p2308_p9 = pnand %p2307_p8, %p2303_p0 }
  0x83   : > { %2311 = shalt.err (!%p2308_p9)
}
  0x84   : > { %s2312_s10 = scalar_lea.vmem %s2732_s6, 256  ;;  %s2481_s29 = smov [#allocation2]  }
  0x85   : > { %p2313_p1 = scmp.ne.s32.totalorder %s2732_s6, %s2312_s10  ;;  %s2317_s22 = sshll.u32 %s2481_s29, 4  ;;  %s2318_s22 = int_to_ptr.vmem [resolvable:$false] %s2317_s22 }
  0x86   : > { %s2319_s12 = scalar_lea.vmem %s2318_s22, 512  ;;  %p2320_p12 = scmp.lt.s32.totalorder %s2732_s6, %s2318_s22 }
  0x87   : > { %p2315_p4 = pnand %p2313_p1, %p2301_p7  ;;  %p2321_p10 = scmp.lt.s32.totalorder %s2319_s12, %s2312_s10 }
  0x89   : > { %p2316_p13 = pneg %p2315_p4  ;;  %p2322_p6 = por %p2321_p10, %p2320_p12 }
  0x8b   : > { %p2323_p2 = pnand %p2322_p6, %p2316_p13 }
  0x8d   : > { %2326 = shalt.err (!%p2323_p2)
}
  0x8e   : > { %1979 = dma.hbm_to_vmem [thread:$0]  (!%p2736_p11), %s2730_s28, 256, %s2732_s6, %s512_s30  }
  0x8f   : > { %s1717_s14 = sshll.u32 %s2469_s21, 7  ;;  %s3014_s29 = sshll.u32 %s2715_s26, 3 }
  0x90   : > { %s2771_s27 = scalar_lea.hbm %s2963_s1, %s1717_s14  ;;  %s534_s10 = scalar_lea.vmem [#allocation5], %s3014_s29 }
  0x91   : > { %s541_s12 = sshll.u32 %s534_s10, 4  ;;  %s3015_s22 = sand.u32 1, %s2469_s21   ;;  %s542_s12 = int_to_ptr.vmem [resolvable:$true] %s541_s12 }
  0x92   : > { %s531_s0 = scalar_lea.sflag [#allocation6], %s3015_s22  ;;  %s2327_s20 = scalar_lea.hbm %s2771_s27, 128 }
  0x93   : > { %p2328_p1 = scmp.ne.s32.totalorder %s2771_s27, %s2327_s20  ;;  %s2332_s28 = scalar_lea.hbm %s2963_s1, 256 }
  0x94   : > { %p2333_p12 = scmp.lt.s32.totalorder %s2771_s27, %s2963_s1  ;;  %p2334_p0 = scmp.lt.s32.totalorder %s2332_s28, %s2327_s20 }
  0x95   : > { %p2330_p6 = pnand %p2328_p1, %p2301_p7 }
  0x96   : > { %p2335_p5 = por %p2334_p0, %p2333_p12 }
  0x97   : > { %p2331_p10 = pneg %p2330_p6 }
  0x99   : > { %p2336_p8 = pnand %p2335_p5, %p2331_p10 }
  0x9b   : > { %2339 = shalt.err (!%p2336_p8)
}
  0x9c   : > { %s2340_s17 = scalar_lea.vmem %s542_s12, 128  ;;  %s2482_s4 = smov [#allocation5]  }
  0x9d   : > { %p2341_p9 = scmp.ne.s32.totalorder %s542_s12, %s2340_s17  ;;  %s2345_s29 = sshll.u32 %s2482_s4, 4  ;;  %s2346_s29 = int_to_ptr.vmem [resolvable:$false] %s2345_s29 }
  0x9e   : > { %s2347_s10 = scalar_lea.vmem %s2346_s29, 256  ;;  %p2348_p2 = scmp.lt.s32.totalorder %s542_s12, %s2346_s29 }
  0x9f   : > { %p2343_p4 = pnand %p2341_p9, %p2301_p7  ;;  %p2349_p1 = scmp.lt.s32.totalorder %s2347_s10, %s2340_s17 }
  0xa1   : > { %p2344_p13 = pneg %p2343_p4  ;;  %p2350_p6 = por %p2349_p1, %p2348_p2 }
  0xa3   : > { %p2351_p3 = pnand %p2350_p6, %p2344_p13 }
  0xa5   : > { %2354 = shalt.err (!%p2351_p3)
}
  0xa6   : > { %1982 = dma.hbm_to_vmem [thread:$0]  (!%p2736_p11), %s2771_s27, 128, %s542_s12, %s531_s0  }
  0xa7   : > { %p3016_p10 = scmp.ne.s32.totalorder %s2996_s25, 0 }
  0xa8   : > { %s2798_s20 = sand.u32 (!%p3016_p10), 1, %s2461_s19   ;;  %p3017_p7 = scmp.ne.s32.totalorder (!%p3016_p10), %s3009_s2, 0 }
  0xa9   : > { %550 = sbr.rel (%p3016_p10) target bundleno = 1483 (0x5cb), region = 76  ;;  %s2801_s22 = sshll.u32 (!%p3016_p10), %s2798_s20, 4 }
  0xaa   : > { %s553_s6 = scalar_lea.sflag (!%p3016_p10), [#allocation3], %s2798_s20  ;;  %s556_s30 = scalar_lea.vmem (!%p3016_p10), [#allocation2], %s2801_s22 }
  0xae   : > { %2424 = dma.done.wait (%p3017_p7), %s553_s6, 256  }
  0xaf   : > { %2426 = vsyncadd (%p3017_p7), %s553_s6, 4294967040  ;;  %s561_s0 = sand.u32 1, %s2589_s24   ;;  %s1720_s8 = sshll.u32 %s2798_s20, 3 }
  0xb0   : > { %s562_s25 = scalar_lea.sflag [#allocation6], %s561_s0  ;;  %s2811_s27 = scalar_lea.vmem [#allocation5], %s1720_s8 }
  0xb1   : > { %2428 = dma.done.wait (%p3017_p7), %s562_s25, 128  }
  0xb2   : > { %2430 = vsyncadd (%p3017_p7), %s562_s25, 4294967168  ;;  %p3018_p3 = scmp.eq.s32.totalorder %s2589_s24, 0 }
  0xb4   : > { %2432 = dma.done.wait (%p3018_p3), [#allocation6], 2048   ;;  %p3019_p11 = pmov %p3018_p3 }
  0xb5   : > { %p3020_p12 = pmov %p3018_p3 }
  0xb6   : > { %2434 = vsyncadd (%p3019_p11), [#allocation6], 4294965248 }
  0xb7   : > { %2436 = dma.done.wait (%p3020_p12), [#allocation9], 3072   ;;  %p3021_p0 = pmov %p3018_p3 }
  0xb9   : > { %2438 = vsyncadd (%p3021_p0), [#allocation9], 4294964224  ;;  %p3022_p5 = pmov %p3021_p0 }
  0xba   : > { %p3023_p8 = pmov %p3021_p0 }
  0xbb   : > { %2440 = dma.done.wait (%p3022_p5), [#allocation12], 2048  }
  0xbc   : > { %2442 = vsyncadd (%p3023_p8), [#allocation12], 4294965248  ;;  %p3024_p9 = pmov %p3021_p0 }
  0xbd   : > { %p3025_p4 = pmov %p3021_p0 }
  0xbe   : > { %2444 = dma.done.wait (%p3024_p9), [#allocation15], 2048  }
  0xbf   : > { %2446 = vsyncadd (%p3025_p4), [#allocation15], 4294965248  ;;  %v2483_v0 = vmov 0.0   ;;  %v2049_v1 = vld [vmem:[#allocation7 + $0x78] sm:$0xff]   ;;  %v2051_v3 = vld [vmem:[#allocation7 + $0x70] sm:$0xff]   ;;  %vm2484_vm0 = vmmov 0  }
  0xc0   : > { %1865 = vmatprep.subr.bf16.mxu1 %v2483_v0  ;;  %v2050_v2 = vld [vmem:[#allocation7 + $0x38] sm:$0xff]   ;;  %1816 = vmatprep.subr.bf16.mxu0 %v2049_v1  ;;  %v2052_v4 = vld [vmem:[#allocation7 + $0x30] sm:$0xff]   ;;  %v2053_v5 = vld [vmem:[#allocation7 + $0x68] sm:$0xff]   ;;  %v2485_v55 = vmov 0   ;;  %s2885_s4 = scalar_lea.vmem [#allocation17], %s2801_s22  ;;  %s1814_s0 = sshll.u32 %s2589_s24, 8 }
  0xc1   : > { %1817 = vmatpush3.bf16.msra.mxu0 %v2050_v2  ;;  %v2054_v6 = vld [vmem:[#allocation7 + $0x28] sm:$0xff]   ;;  %v2055_v7 = vld [vmem:[#allocation7 + $0x60] sm:$0xff]   ;;  %v2057_v9 = vld [vmem:[#allocation7 + $0x58] sm:$0xff]   ;;  %1881 = vmatprep.mubr.msk.bf16.mxu1 %vm2484_vm0, %v2483_v0  ;;  %s1522_s2 = sshll.u32 %s2885_s4, 4  ;;  %s1494_s12 = scalar_lea.sflag [#allocation18], %s2798_s20  ;;  %s1523_s2 = int_to_ptr.vmem [resolvable:$true] %s1522_s2 }
  0xc2   : > { %1818 = vmatprep.subr.bf16.mxu0 %v2051_v3  ;;  %v2056_v8 = vld [vmem:[#allocation7 + $0x20] sm:$0xff]   ;;  %v2058_v10 = vld [vmem:[#allocation7 + $0x18] sm:$0xff]   ;;  %v2059_v11 = vld [vmem:[#allocation7 + $0x50] sm:$0xff]   ;;  %s2355_s28 = scalar_lea.vmem %s1523_s2, 256  ;;  %p3026_p2 = scmp.ne.s32.totalorder %s3010_s23, 0 }
  0xc3   : > { %v648_v12 = vld [vmem:[%s556_s30 + $0x8] sm:$0xff]  ;;  %v2060_v15 = vld [vmem:[#allocation7 + $0x10] sm:$0xff]   ;;  %v2063_v19 = vld [vmem:[#allocation7 + $0x40] sm:$0xff]   ;;  %p2356_p13 = scmp.ne.s32.totalorder %s1523_s2, %s2355_s28  ;;  %s2486_s14 = smov [#allocation17]  }
  0xc4   : > { %v650_v13 = vpack.c.bf16 %v648_v12, %v648_v12  ;;  %v2065_v14 = vld [vmem:[#allocation8 + $0x38] sm:$0xff]   ;;  %v2061_v16 = vld [vmem:[#allocation7 + $0x48] sm:$0xff]   ;;  %v2066_v17 = vld [vmem:[#allocation8 + $0x30] sm:$0xff]   ;;  %s2359_s26 = sshll.u32 %s2486_s14, 4  ;;  %s2360_s26 = int_to_ptr.vmem [resolvable:$false] %s2359_s26 }
  0xc5   : > { %1819 = vmatpush3.bf16.msra.mxu0 %v2052_v4  ;;  %1866 = vmatpush3.bf16.msra.mxu1 %v2065_v14  ;;  %v2062_v18 = vld [vmem:[#allocation7 + $0x8] sm:$0xff]   ;;  %v2064_v21 = vld [vmem:[#allocation7] sm:$0xff]   ;;  %v2069_v25 = vld [vmem:[#allocation8 + $0x18] sm:$0xff]   ;;  %p2357_p1 = pnand %p2356_p13, %p3026_p2  ;;  %s2361_s17 = scalar_lea.vmem %s2360_s26, 512 }
  0xc6   : > { %1820 = vmatprep.subr.bf16.mxu0 %v2053_v5  ;;  %818 = vmatprep.mubr.bf16.mxu0 %v650_v13  ;;  %v2067_v20 = vld [vmem:[#allocation8 + $0x28] sm:$0xff]   ;;  %v647_v22 = vld [vmem:[%s556_s30] sm:$0xff]  ;;  %v2097_v56 = vld [vmem:[#allocation11 + $0x38] sm:$0xff]   ;;  %p2362_p10 = scmp.lt.s32.totalorder %s1523_s2, %s2360_s26  ;;  %p2363_p7 = scmp.lt.s32.totalorder %s2361_s17, %s2355_s28 }
  0xc7   : > { %1867 = vmatprep.subr.bf16.mxu1 %v2483_v0  ;;  %v2068_v23 = vld [vmem:[#allocation8 + $0x20] sm:$0xff]   ;;  %v649_v24 = vpack.c.bf16 %v647_v22, %v647_v22  ;;  %v2070_v26 = vld [vmem:[#allocation8 + $0x10] sm:$0xff]   ;;  %v2071_v27 = vld [vmem:[#allocation8 + $0x8] sm:$0xff]   ;;  %p2358_p6 = pneg %p2357_p1 }
  0xc8   : > { %v2072_v28 = vld [vmem:[#allocation8] sm:$0xff]   ;;  %v2073_v29 = vld [vmem:[#allocation10 + $0x70] ss:$8 sps:$4 sm:$0xff]   ;;  %v2075_v30 = vld [vmem:[#allocation10 + $0x74] ss:$8 sps:$4 sm:$0xff]   ;;  %p2364_p3 = por %p2363_p7, %p2362_p10 }
  0xc9   : > { %1821 = vmatpush3.bf16.msra.mxu0 %v2054_v6  ;;  %1868 = vmatpush3.bf16.msra.mxu1 %v2066_v17  ;;  %v2078_v31 = vld [vmem:[#allocation10 + $0x64] ss:$8 sps:$4 sm:$0xff]   ;;  %v2076_v32 = vld [vmem:[#allocation10 + $0x60] ss:$8 sps:$4 sm:$0xff]   ;;  %v2081_v33 = vld [vmem:[#allocation10 + $0x54] ss:$8 sps:$4 sm:$0xff]  }
  0xca   : > { %1822 = vmatprep.subr.bf16.mxu0 %v2055_v7  ;;  %1869 = vmatprep.subr.bf16.mxu1 %v2483_v0  ;;  %v2079_v34 = vld [vmem:[#allocation10 + $0x50] ss:$8 sps:$4 sm:$0xff]   ;;  %v2084_v35 = vld [vmem:[#allocation10 + $0x44] ss:$8 sps:$4 sm:$0xff]   ;;  %v2082_v36 = vld [vmem:[#allocation10 + $0x40] ss:$8 sps:$4 sm:$0xff]   ;;  %p2365_p11 = pnand %p2364_p3, %p2358_p6 }
  0xcb   : > { %v2087_v37 = vld [vmem:[#allocation10 + $0x34] ss:$8 sps:$4 sm:$0xff]   ;;  %v2085_v38 = vld [vmem:[#allocation10 + $0x30] ss:$8 sps:$4 sm:$0xff]   ;;  %v2090_v39 = vld [vmem:[#allocation10 + $0x24] ss:$8 sps:$4 sm:$0xff]  }
  0xcc   : > { %v2088_v40 = vld [vmem:[#allocation10 + $0x20] ss:$8 sps:$4 sm:$0xff]   ;;  %v1729_v42 = vld [vmem:[%s2965_s3] ss:$0 sm:$0xff]  ;;  %v2093_v51 = vld [vmem:[#allocation10 + $0x14] ss:$8 sps:$4 sm:$0xff]  }
  0xcd   : > { %1823 = vmatpush3.bf16.msra.mxu0 %v2056_v8  ;;  %1870 = vmatpush3.bf16.msra.mxu1 %v2067_v20  ;;  %v2091_v52 = vld [vmem:[#allocation10 + $0x10] ss:$8 sps:$4 sm:$0xff]   ;;  %v2096_v53 = vld [vmem:[#allocation10 + $0x4] ss:$8 sps:$4 sm:$0xff]   ;;  %v2094_v54 = vld [vmem:[#allocation10] ss:$8 sps:$4 sm:$0xff]  }
  0xce   : > { %1824 = vmatprep.subr.bf16.mxu0 %v2057_v9  ;;  %1871 = vmatprep.subr.bf16.mxu1 %v2483_v0  ;;  %v1746_v57 = vld [vmem:[%s2967_s5] ss:$0 sm:$0xff]  ;;  %v2099_v4 = vld [vmem:[#allocation11 + $0x28] sm:$0xff]   ;;  %v2100_v5 = vld [vmem:[#allocation11 + $0x20] sm:$0xff]  }
  0xcf   : > { %v2098_v3 = vld [vmem:[#allocation11 + $0x30] sm:$0xff]   ;;  %v2101_v6 = vld [vmem:[#allocation11 + $0x18] sm:$0xff]   ;;  %v2103_v8 = vld [vmem:[#allocation11 + $0x8] sm:$0xff]  }
  0xd0   : > { %v2102_v7 = vld [vmem:[#allocation11 + $0x10] sm:$0xff]   ;;  %v2104_v9 = vld [vmem:[#allocation11] sm:$0xff]   ;;  %v2107_v12 = vld [vmem:[#allocation13 + $0x28] sm:$0xff]  }
  0xd1   : > { %1825 = vmatpush3.bf16.msra.mxu0 %v2058_v10  ;;  %1872 = vmatpush3.bf16.msra.mxu1 %v2068_v23  ;;  %v2105_v10 = vld [vmem:[#allocation13 + $0x38] sm:$0xff]   ;;  %v2108_v13 = vld [vmem:[#allocation13 + $0x20] sm:$0xff]  }
  0xd2   : > { %1826 = vmatprep.subr.bf16.mxu0 %v2059_v11  ;;  %1873 = vmatprep.subr.bf16.mxu1 %v2483_v0  ;;  %v2106_v11 = vld [vmem:[#allocation13 + $0x30] sm:$0xff]   ;;  %v2109_v14 = vld [vmem:[#allocation13 + $0x18] sm:$0xff]  }
  0xd5   : > { %1827 = vmatpush3.bf16.msra.mxu0 %v2060_v15  ;;  %1874 = vmatpush3.bf16.msra.mxu1 %v2069_v25  ;;  %v2110_v15 = vld [vmem:[#allocation13 + $0x10] sm:$0xff]  }
  0xd6   : > { %1828 = vmatprep.subr.bf16.mxu0 %v2061_v16  ;;  %1875 = vmatprep.subr.bf16.mxu1 %v2483_v0  ;;  %v961_v16 = vlaneseq }
  0xd8   : > { %v2873_v17 = vshrl.u32 %v961_v16, 7 }
  0xd9   : > { %1829 = vmatpush3.bf16.msra.mxu0 %v2062_v18  ;;  %1876 = vmatpush3.bf16.msra.mxu1 %v2070_v26 }
  0xda   : > { %1830 = vmatprep.subr.bf16.mxu0 %v2063_v19  ;;  %1877 = vmatprep.subr.bf16.mxu1 %v2483_v0  ;;  %v963_v18 = vsub.s32 0, %v2873_v17  ;;  %v959_v19 = vld [vmem:[%s2969_s7] sm:$0x3]  ;;  %v967_v20 = vsub.s32 1, %v2873_v17 }
  0xdc   : > { %v968_v22 = vrot.slane %v959_v19, %v967_v20 }
  0xdd   : > { %1831 = vmatpush3.bf16.msra.mxu0 %v2064_v21  ;;  %1878 = vmatpush3.bf16.msra.mxu1 %v2071_v27  ;;  %v964_v21 = vrot.slane %v959_v19, %v963_v18 }
  0xde   : > { %1879 = vmatprep.subr.bf16.mxu1 %v2483_v0  ;;  %1051 = vmatprep.subr.bf16.mxu0 %v2075_v30 }
  0xe0   : > { %819 = vmatmul.mubr.bf16.vlgmr.msra.gmra.mxu0 %v649_v24 }
  0xe1   : > { %1880 = vmatpush3.bf16.msra.mxu1 %v2072_v28  ;;  %1052 = vmatpush1.bf16.msra.mxu0 %v2073_v29 }
  0xe2   : > { %1885 = vmatprep.subr.bf16.mxu1 %v2483_v0  ;;  %1053 = vmatprep.subr.bf16.mxu0 %v2078_v31  ;;  %v1097_v31 = vld [vmem:[%s2811_s27] sm:$0xff]  ;;  %s1520_s27 = scalar_lea.hbm %s2977_s15, %s1814_s0 }
  0xe3   : > { %1083 = vmatprep.mubr.bf16.mxu0 %v2485_v55 }
  0xe5   : > { %1054 = vmatpush1.bf16.msra.mxu0 %v2076_v32 }
  0xe6   : > { %1055 = vmatprep.subr.bf16.mxu0 %v2081_v33 }
  0xe9   : > { %1056 = vmatpush1.bf16.msra.mxu0 %v2079_v34 }
  0xea   : > { %1057 = vmatprep.subr.bf16.mxu0 %v2084_v35 }
  0xed   : > { %1058 = vmatpush1.bf16.msra.mxu0 %v2082_v36  ;;  %v2111_v36 = vld [vmem:[#allocation13 + $0x8] sm:$0xff]  }
  0xee   : > { %1059 = vmatprep.subr.bf16.mxu0 %v2087_v37  ;;  %v2112_v37 = vld [vmem:[#allocation13] sm:$0xff]  }
  0xf1   : > { %1060 = vmatpush1.bf16.msra.mxu0 %v2085_v38  ;;  %v2113_v38 = vld [vmem:[#allocation14 + $0x70] ss:$8 sps:$4 sm:$0xff]  }
  0xf2   : > { %1061 = vmatprep.subr.bf16.mxu0 %v2090_v39  ;;  %v2115_v39 = vld [vmem:[#allocation14 + $0x74] ss:$8 sps:$4 sm:$0xff]  }
  0xf5   : > { %1062 = vmatpush1.bf16.msra.mxu0 %v2088_v40  ;;  %v2118_v40 = vld [vmem:[#allocation14 + $0x64] ss:$8 sps:$4 sm:$0xff]  }
  0xf6   : > { %1063 = vmatprep.subr.bf16.mxu0 %v2093_v51 }
  0xf9   : > { %1064 = vmatpush1.bf16.msra.mxu0 %v2091_v52 }
  0xfa   : > { %1065 = vmatprep.subr.bf16.mxu0 %v2096_v53 }
  0xfd   : > { %1066 = vmatpush1.bf16.msra.mxu0 %v2094_v54 }
  0xfe   : > { %1905 = vmatprep.subr.bf16.mxu0 %v2483_v0 }
 0x1a0   : > { %v1832_v41 = vpop.f32.mrf.mxu0 }
 0x1a2   : > { %v1833_v43 = vpop.f32.mrf.mxu0 }
 0x1a3   : > { %v1834_v44 = vadd.f32 %v1833_v43, %v1832_v41  ;;  %v2116_v41 = vld [vmem:[#allocation14 + $0x60] ss:$8 sps:$4 sm:$0xff]   ;;  %v2119_v43 = vld [vmem:[#allocation14 + $0x50] ss:$8 sps:$4 sm:$0xff]  }
 0x1a4   : > { %v1835_v45 = vpop.f32.mrf.mxu0 }
 0x1a5   : > { %v821_v46 = vadd.f32 %v1834_v44, %v1729_v42  ;;  %v2121_v42 = vld [vmem:[#allocation14 + $0x54] ss:$8 sps:$4 sm:$0xff]   ;;  %v2124_v44 = vld [vmem:[#allocation14 + $0x44] ss:$8 sps:$4 sm:$0xff]   ;;  %v2122_v45 = vld [vmem:[#allocation14 + $0x40] ss:$8 sps:$4 sm:$0xff]  }
 0x1a6   : > { %v1836_v47 = vpop.f32.mrf.mxu0 }
 0x1a7   : > { %v826_v48 = vmul.f32 0.2, %v821_v46  ;;  %v2130_v47 = vld [vmem:[#allocation14 + $0x24] ss:$8 sps:$4 sm:$0xff]  }
 0x1a9   : > { %v827_v49 = vmax.f32 %v821_v46, %v826_v48  ;;  %v2127_v46 = vld [vmem:[#allocation14 + $0x34] ss:$8 sps:$4 sm:$0xff]   ;;  %v2128_v48 = vld [vmem:[#allocation14 + $0x20] ss:$8 sps:$4 sm:$0xff]  }
 0x1ab   : > { %v828_v50 = vpack.c.bf16 %v827_v49, %v827_v49  ;;  %v1771_v49 = vld [vmem:[%s2971_s9] ss:$0 sm:$0xff] }
 0x1ad   : > { %1882 = vmatmul.mubr.bf16.vlgmr.msra.gmra.mxu1 %v828_v50 }
 0x1ae   : > { %1901 = vmatprep.mubr.msk.bf16.mxu1 %vm2484_vm0, %v2483_v0  ;;  %1886 = vmatpush3.bf16.msra.mxu1 %v2097_v56 }
 0x1af   : > { %1887 = vmatprep.subr.bf16.mxu1 %v2483_v0 }
 0x1b2   : > { %1888 = vmatpush3.bf16.msra.mxu1 %v2098_v3 }
 0x1b3   : > { %1889 = vmatprep.subr.bf16.mxu1 %v2483_v0 }
 0x1b6   : > { %1890 = vmatpush3.bf16.msra.mxu1 %v2099_v4 }
 0x1b7   : > { %1891 = vmatprep.subr.bf16.mxu1 %v2483_v0 }
 0x1ba   : > { %1892 = vmatpush3.bf16.msra.mxu1 %v2100_v5 }
 0x1bb   : > { %1893 = vmatprep.subr.bf16.mxu1 %v2483_v0 }
 0x1be   : > { %1894 = vmatpush3.bf16.msra.mxu1 %v2101_v6 }
 0x1bf   : > { %1895 = vmatprep.subr.bf16.mxu1 %v2483_v0 }
 0x1c2   : > { %1896 = vmatpush3.bf16.msra.mxu1 %v2102_v7 }
 0x1c3   : > { %1897 = vmatprep.subr.bf16.mxu1 %v2483_v0 }
 0x1c6   : > { %1898 = vmatpush3.bf16.msra.mxu1 %v2103_v8 }
 0x1c7   : > { %1899 = vmatprep.subr.bf16.mxu1 %v2483_v0 }
 0x1ca   : > { %1900 = vmatpush3.bf16.msra.mxu1 %v2104_v9 }
 0x1cb   : > { %1437 = vmatprep.subr.bf16.mxu1 %v2115_v39 }
 0x26d   : > { %v934_v58 = vpop.f32.mrf.mxu1 }
 0x26e   : > { %v935_v59 = vadd.f32 %v1746_v57, %v934_v58  ;;  %v2133_v58 = vld [vmem:[#allocation14 + $0x14] ss:$8 sps:$4 sm:$0xff]  }
 0x26f   : > { %v1883_v60 = vpop.f32.mrf.mxu1 }
 0x270   : > { %v940_v61 = vmul.f32 0.2, %v935_v59  ;;  %v2136_v60 = vld [vmem:[#allocation14 + $0x4] ss:$8 sps:$4 sm:$0xff]  }
 0x271   : > { %v937_v62 = vpop.f32.mrf.mxu1 }
 0x272   : > { %v941_v63 = vmax.f32 %v935_v59, %v940_v61  ;;  %v2131_v59 = vld [vmem:[#allocation14 + $0x10] ss:$8 sps:$4 sm:$0xff]   ;;  %v2134_v61 = vld [vmem:[#allocation14] ss:$8 sps:$4 sm:$0xff]  }
 0x273   : > { %v1884_v1 = vpop.f32.mrf.mxu1  ;;  %v1780_v62 = vld [vmem:[%s2973_s11] ss:$0 sm:$0xff] }
 0x274   : > { %v942_v2 = vpack.c.bf16 %v941_v63, %v941_v63 }
 0x276   : > { %1084 = vmatmul.mubr.bf16.vlgmr.msra.gmra.mxu0 %v942_v2 }
 0x277   : > { %1921 = vmatprep.mubr.msk.bf16.mxu0 %vm2484_vm0, %v2483_v0  ;;  %1906 = vmatpush3.bf16.msra.mxu0 %v2105_v10 }
 0x278   : > { %1907 = vmatprep.subr.bf16.mxu0 %v2483_v0 }
 0x27b   : > { %1908 = vmatpush3.bf16.msra.mxu0 %v2106_v11 }
 0x27c   : > { %1909 = vmatprep.subr.bf16.mxu0 %v2483_v0 }
 0x27f   : > { %1910 = vmatpush3.bf16.msra.mxu0 %v2107_v12 }
 0x280   : > { %1911 = vmatprep.subr.bf16.mxu0 %v2483_v0 }
 0x283   : > { %1912 = vmatpush3.bf16.msra.mxu0 %v2108_v13 }
 0x284   : > { %1913 = vmatprep.subr.bf16.mxu0 %v2483_v0 }
 0x287   : > { %1914 = vmatpush3.bf16.msra.mxu0 %v2109_v14 }
 0x288   : > { %1915 = vmatprep.subr.bf16.mxu0 %v2483_v0 }
 0x28b   : > { %1916 = vmatpush3.bf16.msra.mxu0 %v2110_v15 }
 0x28c   : > { %1917 = vmatprep.subr.bf16.mxu0 %v2483_v0 }
 0x28f   : > { %1918 = vmatpush3.bf16.msra.mxu0 %v2111_v36 }
 0x290   : > { %1919 = vmatprep.subr.bf16.mxu0 %v2483_v0  ;;  %v2125_v0 = vld [vmem:[#allocation14 + $0x30] ss:$8 sps:$4 sm:$0xff]  }
 0x293   : > { %1920 = vmatpush3.bf16.msra.mxu0 %v2112_v37 }
 0x336   : > { %v1085_v23 = vpop.f32.mrf.mxu0 }
 0x337   : > { %v1086_v24 = vadd.f32 %v1085_v23, %v964_v21 }
 0x338   : > { %v1087_v25 = vpop.f32.mrf.mxu0 }
 0x339   : > { %1092 = vst [vmem:[%s2885_s4] sm:$0xff] %v1086_v24  ;;  %v1088_v26 = vadd.f32 %v1087_v25, %v968_v22 }
 0x33a   : > { %v1089_v27 = vpop.f32.mrf.mxu0 }
 0x33b   : > { %1093 = vst [vmem:[%s2885_s4 + $0x8] sm:$0xff] %v1088_v26  ;;  %v1094_v28 = vmul.f32 0.5, %v1088_v26 }
 0x33c   : > { %v1090_v29 = vpop.f32.mrf.mxu0 }
 0x33d   : > { %v1095_v30 = vmul.f32 1.442695, %v1094_v28 }
 0x33f   : > { %2137 = vpow2.f32 %v1095_v30 }
 0x34c   : > { %v2138_v32 = vpop.eup %2137 }
 0x34d   : > { %v1098_v33 = vmul.f32 %v2138_v32, %v1097_v31 }
 0x34f   : > { %v1099_v34 = vadd.f32 %v1098_v33, %v1086_v24 }
 0x351   : > { %v1100_v35 = vpack.c.bf16 %v1099_v34, %v1099_v34 }
 0x353   : > { %1902 = vmatmul.mubr.bf16.vlgmr.msra.gmra.mxu1 %v1100_v35 }
 0x354   : > { %1469 = vmatprep.mubr.bf16.mxu1 %v2485_v55  ;;  %1438 = vmatpush1.bf16.msra.mxu1 %v2113_v38 }
 0x355   : > { %1439 = vmatprep.subr.bf16.mxu1 %v2118_v40 }
 0x358   : > { %1440 = vmatpush1.bf16.msra.mxu1 %v2116_v41 }
 0x359   : > { %1441 = vmatprep.subr.bf16.mxu1 %v2121_v42 }
 0x35c   : > { %1442 = vmatpush1.bf16.msra.mxu1 %v2119_v43 }
 0x35d   : > { %1443 = vmatprep.subr.bf16.mxu1 %v2124_v44 }
 0x360   : > { %1444 = vmatpush1.bf16.msra.mxu1 %v2122_v45 }
 0x361   : > { %1445 = vmatprep.subr.bf16.mxu1 %v2127_v46 }
 0x364   : > { %1446 = vmatpush1.bf16.msra.mxu1 %v2125_v0 }
 0x365   : > { %1447 = vmatprep.subr.bf16.mxu1 %v2130_v47 }
 0x368   : > { %1448 = vmatpush1.bf16.msra.mxu1 %v2128_v48 }
 0x369   : > { %1449 = vmatprep.subr.bf16.mxu1 %v2133_v58 }
 0x36c   : > { %1450 = vmatpush1.bf16.msra.mxu1 %v2131_v59 }
 0x36d   : > { %1451 = vmatprep.subr.bf16.mxu1 %v2136_v60 }
 0x370   : > { %1452 = vmatpush1.bf16.msra.mxu1 %v2134_v61 }
 0x413   : > { %v1206_v50 = vpop.f32.mrf.mxu1 }
 0x414   : > { %v1207_v51 = vadd.f32 %v1771_v49, %v1206_v50 }
 0x415   : > { %v1903_v52 = vpop.f32.mrf.mxu1 }
 0x416   : > { %v1212_v53 = vmul.f32 0.2, %v1207_v51 }
 0x417   : > { %v1209_v54 = vpop.f32.mrf.mxu1 }
 0x418   : > { %v1213_v55 = vmax.f32 %v1207_v51, %v1212_v53 }
 0x419   : > { %v1904_v56 = vpop.f32.mrf.mxu1 }
 0x41a   : > { %v1214_v57 = vpack.c.bf16 %v1213_v55, %v1213_v55 }
 0x41c   : > { %1922 = vmatmul.mubr.bf16.vlgmr.msra.gmra.mxu0 %v1214_v57 }
 0x4dc   : > { %v1320_v63 = vpop.f32.mrf.mxu0 }
 0x4dd   : > { %v1321_v1 = vadd.f32 %v1780_v62, %v1320_v63 }
 0x4de   : > { %v1923_v2 = vpop.f32.mrf.mxu0 }
 0x4df   : > { %v1326_v3 = vmul.f32 0.2, %v1321_v1 }
 0x4e0   : > { %v1323_v4 = vpop.f32.mrf.mxu0 }
 0x4e1   : > { %v1327_v5 = vmax.f32 %v1321_v1, %v1326_v3 }
 0x4e2   : > { %v1924_v6 = vpop.f32.mrf.mxu0 }
 0x4e3   : > { %v1328_v7 = vpack.c.bf16 %v1327_v5, %v1327_v5 }
 0x4e5   : > { %1470 = vmatmul.mubr.bf16.vlgmr.msra.gmra.mxu1 %v1328_v7 }
 0x4e6   : > { %2368 = shalt.err (!%p2365_p11)
}
 0x4e7   : > { %s2369_s29 = scalar_lea.hbm %s1520_s27, 256  ;;  %s2373_s6 = scalar_lea.hbm %s2977_s15, 512 }
 0x4e8   : > { %p2370_p12 = scmp.ne.s32.totalorder %s1520_s27, %s2369_s29  ;;  %p2374_p8 = scmp.lt.s32.totalorder %s1520_s27, %s2977_s15 }
 0x4e9   : > { %p2375_p9 = scmp.lt.s32.totalorder %s2373_s6, %s2369_s29 }
 0x4ea   : > { %p2371_p0 = pnand %p2370_p12, %p3026_p2 }
 0x4eb   : > { %p2376_p4 = por %p2375_p9, %p2374_p8 }
 0x4ec   : > { %p2372_p5 = pneg %p2371_p0 }
 0x4ee   : > { %p2377_p13 = pnand %p2376_p4, %p2372_p5 }
 0x4f0   : > { %2380 = shalt.err (!%p2377_p13)
}
 0x4f1   : > { %1954 = dma.vmem_to_hbm [thread:$0]  (%p3026_p2), %s1523_s2, 256, %s1520_s27, %s1494_s12  }
 0x4f2   : > { %s3027_s14 = sld [smem:[#allocation36_spill]]  ;;  %s638_s27 = scalar_lea.vmem [#allocation16], %s2801_s22 }
 0x4f3   : > { %s1508_s2 = sshll.u32 %s638_s27, 4  ;;  %s3028_s17 = sld [smem:[#allocation37_spill]]  ;;  %s1509_s2 = int_to_ptr.vmem [resolvable:$true] %s1508_s2 }
 0x4f4   : > { %s1489_s4 = scalar_lea.sflag [#allocation4], %s2798_s20  ;;  %s2381_s10 = scalar_lea.vmem %s1509_s2, 256 }
 0x4f5   : > { %p2382_p1 = scmp.ne.s32.totalorder %s1509_s2, %s2381_s10  ;;  %s2487_s6 = smov [#allocation16]  }
 0x4f6   : > { %s2385_s22 = sshll.u32 %s2487_s6, 4  ;;  %s2386_s22 = int_to_ptr.vmem [resolvable:$false] %s2385_s22 }
 0x4f7   : > { %p2383_p6 = pnand %p2382_p1, %p3026_p2  ;;  %s2387_s30 = scalar_lea.vmem %s2386_s22, 512 }
 0x4f8   : > { %v1345_v8 = vld [vmem:[%s3027_s14] sm:$0x3]  ;;  %p2388_p7 = scmp.lt.s32.totalorder %s1509_s2, %s2386_s22  ;;  %p2389_p3 = scmp.lt.s32.totalorder %s2387_s30, %s2381_s10 }
 0x4f9   : > { %v1350_v9 = vrot.slane %v1345_v8, %v963_v18  ;;  %v1354_v10 = vrot.slane %v1345_v8, %v967_v20  ;;  %s1506_s29 = scalar_lea.hbm %s3028_s17, %s1814_s0  ;;  %p2384_p10 = pneg %p2383_p6 }
 0x4fa   : > { %p2390_p11 = por %p2389_p3, %p2388_p7 }
 0x4fc   : > { %p2391_p12 = pnand %p2390_p11, %p2384_p10 }
 0x5a5   : > { %v1471_v11 = vpop.f32.mrf.mxu1 }
 0x5a6   : > { %v1472_v12 = vadd.f32 %v1471_v11, %v1350_v9 }
 0x5a7   : > { %v1473_v13 = vpop.f32.mrf.mxu1 }
 0x5a8   : > { %v1478_v14 = vmul.f32 0.5, %v1472_v12  ;;  %v1474_v15 = vadd.f32 %v1473_v13, %v1354_v10 }
 0x5a9   : > { %v1475_v16 = vpop.f32.mrf.mxu1 }
 0x5aa   : > { %2139 = vtanh.f32 %v1478_v14  ;;  %v1479_v19 = vmul.f32 0.5, %v1474_v15 }
 0x5ab   : > { %v1476_v21 = vpop.f32.mrf.mxu1 }
 0x5ac   : > { %2141 = vtanh.f32 %v1479_v19 }
 0x5b7   : > { %v2140_v22 = vpop.eup %2139 }
 0x5b8   : > { %v1482_v23 = vadd.f32 1.0, %v2140_v22 }
 0x5b9   : > { %v2142_v24 = vpop.eup %2141 }
 0x5ba   : > { %v1484_v17 = vmul.f32 0.5, %v1482_v23  ;;  %v1483_v18 = vadd.f32 1.0, %v2142_v24 }
 0x5bc   : > { %v1485_v20 = vmul.f32 0.5, %v1483_v18  ;;  %1486 = vst [vmem:[%s638_s27] sm:$0xff] %v1484_v17 }
 0x5be   : > { %1487 = vst [vmem:[%s638_s27 + $0x8] sm:$0xff] %v1485_v20 }
 0x5bf   : > { %2394 = shalt.err (!%p2391_p12)
}
 0x5c0   : > { %s2395_s24 = scalar_lea.hbm %s1506_s29, 256  ;;  %s2399_s8 = scalar_lea.hbm %s3028_s17, 512 }
 0x5c1   : > { %p2396_p0 = scmp.ne.s32.totalorder %s1506_s29, %s2395_s24  ;;  %p2400_p9 = scmp.lt.s32.totalorder %s1506_s29, %s3028_s17 }
 0x5c2   : > { %p2401_p4 = scmp.lt.s32.totalorder %s2399_s8, %s2395_s24 }
 0x5c3   : > { %p2397_p5 = pnand %p2396_p0, %p3026_p2 }
 0x5c4   : > { %p2402_p13 = por %p2401_p4, %p2400_p9 }
 0x5c5   : > { %p2398_p8 = pneg %p2397_p5 }
 0x5c7   : > { %p2403_p1 = pnand %p2402_p13, %p2398_p8 }
 0x5c9   : > { %2406 = shalt.err (!%p2403_p1)
}
 0x5ca   : > { %1953 = dma.vmem_to_hbm [thread:$0]  (%p3026_p2), %s1509_s2, 256, %s1506_s29, %s1489_s4  }
 0x5cb PF: > { %s1534_s14 = sand.u32 1, %s2457_s18   ;;  %p3029_p6 = scmp.ne.s32.totalorder %s3011_s13, 0 }
 0x5cc   : > { %p3030_p10 = scmp.ge.s32.totalorder %s2469_s21, 2  ;;  %s1535_s27 = scalar_lea.sflag [#allocation4], %s1534_s14 }
 0x5ce   : > { %p1984_p7 = pnand %p3030_p10, %p3029_p6 }
 0x5d0   : > { %p1985_p3 = pneg %p1984_p7 }
 0x5d2   : > { %2448 = dma.done.wait (%p1985_p3), %s1535_s27, 256  }
 0x5d3   : > { %2450 = vsyncadd (%p1985_p3), %s1535_s27, 4294967040  ;;  %s1544_s12 = scalar_lea.sflag [#allocation18], %s1534_s14 }
 0x5d4   : > { %2452 = dma.done.wait (%p1985_p3), %s1544_s12, 256  }
 0x5d5   : > { %2454 = vsyncadd (%p1985_p3), %s1544_s12, 4294967040  ;;  %s3031_s26 = sld [smem:[#allocation27_spill]]  ;;  %p38_p2 = scmp.ge.s32.totalorder %s2689_s16, 4  }
 0x5d6   : > { %s3032_s20 = sld [smem:[#allocation28_spill]]  ;;  %s3033_s18 = smov %s2461_s19 }
 0x5d7   : > { %s3035_s21 = smov %s2689_s16  ;;  %40 = sbr.rel (!%p38_p2) target bundleno = 22 (0x16), region = 175 }
 0x5db   : > { %s3034_s19 = smov %s3031_s26 }
 0x5dc   :  { %1549 = vsyncpa [#allocation3], 1 }
 0x5dd   :  { %1551 = vsyncpa [#allocation3 + $0x1], 1 }
 0x5de   :  { %1552 = vsyncpa [#allocation6], 1 }
 0x5df   :  { %1554 = vsyncpa [#allocation6 + $0x1], 1 }
 0x5e0   :  { %1555 = vsyncpa [#allocation9], 1 }
 0x5e1   :  { %1556 = vsyncpa [#allocation12], 1 }
 0x5e2   :  { %1557 = vsyncpa [#allocation15], 1 }
 0x5e3   :  { %1558 = vsyncpa [#allocation4], 1 }
 0x5e4   :  { %1560 = vsyncpa [#allocation4 + $0x1], 1 }
 0x5e5   :  { %1561 = vsyncpa [#allocation18], 1 }
 0x5e6   :  { %1563 = vsyncpa [#allocation18 + $0x1], 1 }

// kernel: tpu_custom_call.1
= control target key start
LH: loop header
LB: loop body
LE: loop exit
PB: predicated region body
PF: predicated region fallthrough
CT: control target
= control target key end

     0   :  { %s2962_s0 = inlined_call_operand.hbm [shape: f32[16,256], index: 0, kind: input, shape index: {}]   ;;  %s2963_s1 = inlined_call_operand.hbm [shape: f32[16,128], index: 1, kind: input, shape index: {}]   ;;  %s2964_s2 = inlined_call_operand.hbm [shape: bf16[256,128], index: 2, kind: input, shape index: {}]   ;;  %s2965_s3 = inlined_call_operand.vmem [shape: f32[1,128], index: 3, kind: input, shape index: {}]   ;;  %s2966_s4 = inlined_call_operand.hbm [shape: bf16[128,128], index: 4, kind: input, shape index: {}]   ;;  %s2967_s5 = inlined_call_operand.vmem [shape: f32[1,128], index: 5, kind: input, shape index: {}]   ;;  %s2968_s6 = inlined_call_operand.hbm [shape: bf16[128,256], index: 6, kind: input, shape index: {}]   ;;  %s2969_s7 = inlined_call_operand.vmem [shape: f32[1,256], index: 7, kind: input, shape index: {}]   ;;  %s2970_s8 = inlined_call_operand.hbm [shape: bf16[128,128], index: 8, kind: input, shape index: {}]   ;;  %s2971_s9 = inlined_call_operand.vmem [shape: f32[1,128], index: 9, kind: input, shape index: {}]   ;;  %s2972_s10 = inlined_call_operand.hbm [shape: bf16[128,128], index: 10, kind: input, shape index: {}]   ;;  %s2973_s11 = inlined_call_operand.vmem [shape: f32[1,128], index: 11, kind: input, shape index: {}]   ;;  %s2974_s12 = inlined_call_operand.hbm [shape: bf16[128,256], index: 12, kind: input, shape index: {}]   ;;  %s2975_s13 = inlined_call_operand.vmem [shape: f32[1,256], index: 13, kind: input, shape index: {}]   ;;  %s2976_s14 = inlined_call_operand.hbm [shape: f32[16,256], index: 14, kind: output, shape index: {0}]   ;;  %s2977_s15 = inlined_call_operand.hbm [shape: f32[16,256], index: 15, kind: output, shape index: {1}]  }
   0x1   :  { %2986 = sst [smem:[#allocation29_spill]] %s2962_s0 }
   0x2   :  { %2987 = sst [smem:[#allocation30_spill]] %s2964_s2 }
   0x3   :  { %2988 = sst [smem:[#allocation31_spill]] %s2966_s4 }
   0x4   :  { %2989 = sst [smem:[#allocation32_spill]] %s2968_s6 }
   0x5   :  { %2990 = sst [smem:[#allocation33_spill]] %s2970_s8 }
   0x6   :  { %2991 = sst [smem:[#allocation34_spill]] %s2972_s10 }
   0x7   :  { %2992 = sst [smem:[#allocation35_spill]] %s2974_s12 }
   0x8   :  { %2993 = sst [smem:[#allocation36_spill]] %s2975_s13 }
   0x9   :  { %2994 = sst [smem:[#allocation37_spill]] %s2976_s14 }
   0xa   :  { %21 = vsyncpa [#allocation3], 0 }
   0xb   :  { %23 = vsyncpa [#allocation3 + $0x1], 0 }
   0xc   :  { %24 = vsyncpa [#allocation6], 0 }
   0xd   :  { %26 = vsyncpa [#allocation6 + $0x1], 0 }
   0xe   :  { %27 = vsyncpa [#allocation9], 0 }
   0xf   :  { %28 = vsyncpa [#allocation12], 0 }
  0x10   :  { %29 = vsyncpa [#allocation15], 0 }
  0x11   :  { %30 = vsyncpa [#allocation4], 0 }
  0x12   :  { %32 = vsyncpa [#allocation4 + $0x1], 0 }
  0x13   :  { %33 = vsyncpa [#allocation18], 0 }
  0x14   :  { %35 = vsyncpa [#allocation18 + $0x1], 0  ;;  %s2568_s18 = smov 0   ;;  %s2570_s19 = smov 0  }
  0x15   :  { %s2572_s20 = smov 0   ;;  %s2574_s21 = smov 0  }
  0x16 LB: > { %2995 = sst [smem:[#allocation27_spill]] %s2465_s20  ;;  %s2471_s22 = smov [#allocation7]   ;;  %s2469_s21 = sphi %s2574_s21, %s3035_s21   ;;  %s2465_s20 = sphi %s2572_s20, %s3032_s20   ;;  %s2461_s19 = sphi %s2570_s19, %s3034_s19   ;;  %s2457_s18 = sphi %s2568_s18, %s3033_s18  }
  0x17   : > { %s414_s23 = sshll.u32 %s2471_s22, 4  ;;  %s2589_s24 = sadd.s32 4294967295, %s2469_s21   ;;  %s415_s23 = int_to_ptr.vmem [resolvable:$true] %s414_s23 }
  0x18   : > { %p1705_p0 = scmp.ge.s32.totalorder %s2469_s21, 1  ;;  %p2981_p1 = scmp.eq.s32.totalorder %s2589_s24, 0 }
  0x19   : > { %p402_p2 = scmp.lt.s32.totalorder %s2469_s21, 3  ;;  %s2472_s26 = smov [#allocation8]  }
  0x1a   : > { %s430_s27 = sshll.u32 %s2472_s26, 4  ;;  %s2473_s29 = smov [#allocation11]   ;;  %s2607_s27 = int_to_ptr.vmem [resolvable:$true] %s430_s27 }
  0x1b   : > { %p2594_p3 = pnand %p1705_p0, %p402_p2  ;;  %s462_s30 = sshll.u32 %s2473_s29, 4  ;;  %s2609_s30 = int_to_ptr.vmem [resolvable:$true] %s462_s30 }
  0x1c   : > { %s2154_s17 = scalar_lea.vmem %s415_s23, 2048  ;;  %p2162_p11 = scmp.lt.s32.totalorder %s415_s23, %s415_s23 }
  0x1d   : > { %s2996_s25 = scalar_select %p2594_p3, 1, 0 }
  0x1e   : > { %p1957_p5 = pneg %p2594_p3  ;;  %p2155_p8 = scmp.ne.s32.totalorder %s415_s23, %s2154_s17 }
  0x1f   : > { %p2163_p12 = scmp.lt.s32.totalorder %s2154_s17, %s2154_s17 }
  0x20   : > { %p2603_p6 = pnand %p1957_p5, %p2981_p1 }
  0x21   : > { %p2164_p13 = por %p2163_p12, %p2162_p11 }
  0x22   : > { %p2613_p7 = pneg %p2603_p6 }
  0x24   : > { %p2157_p9 = pnand %p2155_p8, %p2613_p7 }
  0x26   : > { %p2158_p10 = pneg %p2157_p9 }
  0x28   : > { %p2165_p0 = pnand %p2164_p13, %p2158_p10 }
  0x2a   : > { %2168 = shalt.err (!%p2165_p0)
}
  0x2b   : > { %s2979_s22 = smov 64   ;;  %s2980_s26 = smov 4  }
  0x2c   : > { %s2999_s2 = sld [smem:[#allocation30_spill]]  ;;  %s2180_s13 = scalar_lea.vmem %s2607_s27, 1024 }
  0x2d   : > { %p2181_p2 = scmp.ne.s32.totalorder %s2607_s27, %s2180_s13  ;;  %p2188_p9 = scmp.lt.s32.totalorder %s2607_s27, %s2607_s27 }
  0x2e   : > { %p2189_p10 = scmp.lt.s32.totalorder %s2180_s13, %s2180_s13 }
  0x2f   : > { %p2183_p5 = pnand %p2181_p2, %p2613_p7 }
  0x30   : > { %p2190_p11 = por %p2189_p10, %p2188_p9 }
  0x31   : > { %p2184_p8 = pneg %p2183_p5 }
  0x32   : > { %1960 = dma.hbm_to_vmem [thread:$0]  (!%p2603_p6), %s2999_s2, 2048, %s415_s23, [#allocation6], %s2979_s22, %s2979_s22, %s2980_s26  }
  0x33   : > { %p2191_p12 = pnand %p2190_p11, %p2184_p8 }
  0x35   : > { %2194 = shalt.err (!%p2191_p12)
}
  0x36   : > { %s3000_s4 = sld [smem:[#allocation31_spill]]  ;;  %s2206_s23 = scalar_lea.vmem %s2609_s30, 1024 }
  0x37   : > { %p2207_p13 = scmp.ne.s32.totalorder %s2609_s30, %s2206_s23  ;;  %p2214_p5 = scmp.lt.s32.totalorder %s2609_s30, %s2609_s30 }
  0x38   : > { %p2215_p8 = scmp.lt.s32.totalorder %s2206_s23, %s2206_s23 }
  0x39   : > { %p2209_p0 = pnand %p2207_p13, %p2613_p7 }
  0x3a   : > { %p2216_p9 = por %p2215_p8, %p2214_p5 }
  0x3b   : > { %p2210_p2 = pneg %p2209_p0 }
  0x3c   : > { %1963 = dma.hbm_to_vmem [thread:$0]  (!%p2603_p6), %s3000_s4, 1024, %s2607_s27, [#allocation9], %s2979_s22, %s2979_s22, %s2980_s26  }
  0x3d   : > { %p2217_p10 = pnand %p2216_p9, %p2210_p2 }
  0x3f   : > { %2220 = shalt.err (!%p2217_p10)
}
  0x40   : > { %s3001_s8 = sld [smem:[#allocation33_spill]]  ;;  %s2476_s27 = smov [#allocation10]  }
  0x41   : > { %s446_s17 = sshll.u32 %s2476_s27, 4  ;;  %s447_s17 = int_to_ptr.vmem [resolvable:$true] %s446_s17 }
  0x42   : > { %s2232_s14 = scalar_lea.vmem %s447_s17, 2048  ;;  %p2240_p0 = scmp.lt.s32.totalorder %s447_s17, %s447_s17 }
  0x43   : > { %p2233_p11 = scmp.ne.s32.totalorder %s447_s17, %s2232_s14  ;;  %p2241_p2 = scmp.lt.s32.totalorder %s2232_s14, %s2232_s14 }
  0x45   : > { %p2235_p12 = pnand %p2233_p11, %p2613_p7  ;;  %p2242_p5 = por %p2241_p2, %p2240_p0 }
  0x46   : > { %1969 = dma.hbm_to_vmem [thread:$0]  (!%p2603_p6), %s3001_s8, 1024, %s2609_s30, [#allocation12], %s2979_s22, %s2979_s22, %s2980_s26  }
  0x47   : > { %p2236_p13 = pneg %p2235_p12 }
  0x49   : > { %p2243_p8 = pnand %p2242_p5, %p2236_p13 }
  0x4b   : > { %2246 = shalt.err (!%p2243_p8)
}
  0x4c   : > { %s2477_s23 = smov 128   ;;  %s2478_s2 = smov 8  }
  0x4d   : > { %s3002_s6 = sld [smem:[#allocation32_spill]]  ;;  %s2479_s29 = smov [#allocation13]  }
  0x4e   : > { %s478_s27 = sshll.u32 %s2479_s29, 4  ;;  %s2480_s22 = smov [#allocation14]   ;;  %s479_s27 = int_to_ptr.vmem [resolvable:$true] %s478_s27 }
  0x4f   : > { %s494_s26 = sshll.u32 %s2480_s22, 4  ;;  %s2258_s14 = scalar_lea.vmem %s479_s27, 1024  ;;  %s495_s26 = int_to_ptr.vmem [resolvable:$true] %s494_s26 }
  0x50   : > { %p2259_p9 = scmp.ne.s32.totalorder %s479_s27, %s2258_s14  ;;  %p2266_p12 = scmp.lt.s32.totalorder %s479_s27, %s479_s27 }
  0x51   : > { %p2267_p13 = scmp.lt.s32.totalorder %s2258_s14, %s2258_s14 }
  0x52   : > { %p2261_p10 = pnand %p2259_p9, %p2613_p7 }
  0x53   : > { %1966 = dma.hbm_to_vmem [thread:$0]  (!%p2603_p6), %s3002_s6, 2048, %s447_s17, [#allocation9], %s2477_s23, %s2477_s23, %s2478_s2  }
  0x54   : > { %p2262_p11 = pneg %p2261_p10  ;;  %p2268_p0 = por %p2267_p13, %p2266_p12 }
  0x56   : > { %p2269_p2 = pnand %p2268_p0, %p2262_p11 }
  0x58   : > { %2272 = shalt.err (!%p2269_p2)
}
  0x59   : > { %s3003_s30 = smov 4   ;;  %s3004_s17 = smov 64  }
  0x5a   : > { %s3005_s10 = sld [smem:[#allocation34_spill]]  ;;  %s2284_s22 = scalar_lea.vmem %s495_s26, 2048 }
  0x5b   : > { %p2285_p5 = scmp.ne.s32.totalorder %s495_s26, %s2284_s22  ;;  %p2292_p10 = scmp.lt.s32.totalorder %s495_s26, %s495_s26 }
  0x5c   : > { %p2293_p4 = scmp.lt.s32.totalorder %s2284_s22, %s2284_s22 }
  0x5d   : > { %p2287_p8 = pnand %p2285_p5, %p2613_p7 }
  0x5e   : > { %p2294_p12 = por %p2293_p4, %p2292_p10 }
  0x5f   : > { %p2288_p9 = pneg %p2287_p8 }
  0x60   : > { %1972 = dma.hbm_to_vmem [thread:$0]  (!%p2603_p6), %s3005_s10, 1024, %s479_s27, [#allocation12], %s3004_s17, %s3004_s17, %s3003_s30  }
  0x61   : > { %p2295_p11 = pnand %p2294_p12, %p2288_p9 }
  0x63   : > { %2298 = shalt.err (!%p2295_p11)
}
  0x64   : > { %s3006_s12 = sld [smem:[#allocation35_spill]]  ;;  %s1704_s28 = sadd.s32 4294967294, %s2469_s21  }
  0x65   : > { %s2689_s16 = sadd.s32 1, %s2469_s21   ;;  %s48_s27 = sadd.s32 1, %s2465_s20 }
  0x66   : > { %s45_s4 = ssub.s32 %s2469_s21, %s2689_s16  ;;  %p55_p7 = scmp.ne.s32.totalorder %s2465_s20, %s2461_s19 }
  0x67   : > { %p46_p4 = scmp.eq.s32.totalorder %s45_s4, 0  ;;  %p56_p13 = scmp.eq.s32.totalorder %s2469_s21, 0 }
  0x68   : > { %p61_p0 = scmp.ne.s32.totalorder %s2461_s19, %s2457_s18  ;;  %p363_p5 = scmp.eq.s32.totalorder %s2589_s24, 1 }
  0x69   : > { %s2700_s30 = scalar_select %p46_p4, %s2465_s20, %s48_s27  }
  0x6a   : > { %1975 = dma.hbm_to_vmem [thread:$0]  (!%p2603_p6), %s3006_s12, 2048, %s495_s26, [#allocation15], %s2477_s23, %s2477_s23, %s2478_s2  }
  0x6b   : > { %3007 = sst [smem:[#allocation28_spill]] %s2700_s30  ;;  %p2702_p2 = por %p56_p13, %p55_p7 }
  0x6c   : > { %p2708_p6 = por %p2981_p1, %p61_p0  ;;  %p369_p8 = scmp.eq.s32.totalorder %s1704_s28, 1 }
  0x6d   : > { %p1996_p9 = scmp.lt.s32.totalorder %s2469_s21, 2  ;;  %s2715_s26 = sand.u32 1, %s2465_s20  }
  0x6e   : > { %s3009_s2 = scalar_select %p2708_p6, 1, 0 }
  0x6f   : > { %p2717_p10 = por %p363_p5, %p55_p7  ;;  %p2721_p12 = por %p369_p8, %p61_p0 }
  0x70   : > { %s1713_s29 = sshll.u32 %s2715_s26, 4  ;;  %s1813_s22 = sshll.u32 %s2469_s21, 8 }
  0x71   : > { %s3010_s23 = scalar_select %p2717_p10, 1, 0 }
  0x72   : > { %s3011_s13 = scalar_select %p2721_p12, 1, 0 }
  0x73   : > { %s3012_s0 = sld [smem:[#allocation29_spill]]  ;;  %s515_s27 = scalar_lea.vmem [#allocation2], %s1713_s29 }
  0x74   : > { %s523_s6 = sshll.u32 %s515_s27, 4  ;;  %p2736_p11 = pnand %p1996_p9, %p2702_p2  ;;  %s2732_s6 = int_to_ptr.vmem [resolvable:$true] %s523_s6 }
  0x75   : > { %s512_s30 = scalar_lea.sflag [#allocation3], %s2715_s26 }
  0x76   : > { %p2301_p7 = pneg %p2736_p11 }
  0x79   : > { %s2730_s28 = scalar_lea.hbm %s3012_s0, %s1813_s22  ;;  %s2304_s17 = scalar_lea.hbm %s3012_s0, 512 }
  0x7a   : > { %s2299_s14 = scalar_lea.hbm %s2730_s28, 256  ;;  %p2305_p2 = scmp.lt.s32.totalorder %s2730_s28, %s3012_s0 }
  0x7b   : > { %p2300_p4 = scmp.ne.s32.totalorder %s2730_s28, %s2299_s14  ;;  %p2306_p5 = scmp.lt.s32.totalorder %s2304_s17, %s2299_s14 }
  0x7d   : > { %p2302_p13 = pnand %p2301_p7, %p2300_p4  ;;  %p2307_p8 = por %p2306_p5, %p2305_p2 }
  0x7f   : > { %p2303_p0 = pneg %p2302_p13 }
  0x81   : > { %p2308_p9 = pnand %p2307_p8, %p2303_p0 }
  0x83   : > { %2311 = shalt.err (!%p2308_p9)
}
  0x84   : > { %s2312_s10 = scalar_lea.vmem %s2732_s6, 256  ;;  %s2481_s29 = smov [#allocation2]  }
  0x85   : > { %p2313_p1 = scmp.ne.s32.totalorder %s2732_s6, %s2312_s10  ;;  %s2317_s22 = sshll.u32 %s2481_s29, 4  ;;  %s2318_s22 = int_to_ptr.vmem [resolvable:$false] %s2317_s22 }
  0x86   : > { %s2319_s12 = scalar_lea.vmem %s2318_s22, 512  ;;  %p2320_p12 = scmp.lt.s32.totalorder %s2732_s6, %s2318_s22 }
  0x87   : > { %p2315_p4 = pnand %p2313_p1, %p2301_p7  ;;  %p2321_p10 = scmp.lt.s32.totalorder %s2319_s12, %s2312_s10 }
  0x89   : > { %p2316_p13 = pneg %p2315_p4  ;;  %p2322_p6 = por %p2321_p10, %p2320_p12 }
  0x8b   : > { %p2323_p2 = pnand %p2322_p6, %p2316_p13 }
  0x8d   : > { %2326 = shalt.err (!%p2323_p2)
}
  0x8e   : > { %1979 = dma.hbm_to_vmem [thread:$0]  (!%p2736_p11), %s2730_s28, 256, %s2732_s6, %s512_s30  }
  0x8f   : > { %s1717_s14 = sshll.u32 %s2469_s21, 7  ;;  %s3014_s29 = sshll.u32 %s2715_s26, 3 }
  0x90   : > { %s2771_s27 = scalar_lea.hbm %s2963_s1, %s1717_s14  ;;  %s534_s10 = scalar_lea.vmem [#allocation5], %s3014_s29 }
  0x91   : > { %s541_s12 = sshll.u32 %s534_s10, 4  ;;  %s3015_s22 = sand.u32 1, %s2469_s21   ;;  %s542_s12 = int_to_ptr.vmem [resolvable:$true] %s541_s12 }
  0x92   : > { %s531_s0 = scalar_lea.sflag [#allocation6], %s3015_s22  ;;  %s2327_s20 = scalar_lea.hbm %s2771_s27, 128 }
  0x93   : > { %p2328_p1 = scmp.ne.s32.totalorder %s2771_s27, %s2327_s20  ;;  %s2332_s28 = scalar_lea.hbm %s2963_s1, 256 }
  0x94   : > { %p2333_p12 = scmp.lt.s32.totalorder %s2771_s27, %s2963_s1  ;;  %p2334_p0 = scmp.lt.s32.totalorder %s2332_s28, %s2327_s20 }
  0x95   : > { %p2330_p6 = pnand %p2328_p1, %p2301_p7 }
  0x96   : > { %p2335_p5 = por %p2334_p0, %p2333_p12 }
  0x97   : > { %p2331_p10 = pneg %p2330_p6 }
  0x99   : > { %p2336_p8 = pnand %p2335_p5, %p2331_p10 }
  0x9b   : > { %2339 = shalt.err (!%p2336_p8)
}
  0x9c   : > { %s2340_s17 = scalar_lea.vmem %s542_s12, 128  ;;  %s2482_s4 = smov [#allocation5]  }
  0x9d   : > { %p2341_p9 = scmp.ne.s32.totalorder %s542_s12, %s2340_s17  ;;  %s2345_s29 = sshll.u32 %s2482_s4, 4  ;;  %s2346_s29 = int_to_ptr.vmem [resolvable:$false] %s2345_s29 }
  0x9e   : > { %s2347_s10 = scalar_lea.vmem %s2346_s29, 256  ;;  %p2348_p2 = scmp.lt.s32.totalorder %s542_s12, %s2346_s29 }
  0x9f   : > { %p2343_p4 = pnand %p2341_p9, %p2301_p7  ;;  %p2349_p1 = scmp.lt.s32.totalorder %s2347_s10, %s2340_s17 }
  0xa1   : > { %p2344_p13 = pneg %p2343_p4  ;;  %p2350_p6 = por %p2349_p1, %p2348_p2 }
  0xa3   : > { %p2351_p3 = pnand %p2350_p6, %p2344_p13 }
  0xa5   : > { %2354 = shalt.err (!%p2351_p3)
}
  0xa6   : > { %1982 = dma.hbm_to_vmem [thread:$0]  (!%p2736_p11), %s2771_s27, 128, %s542_s12, %s531_s0  }
  0xa7   : > { %p3016_p10 = scmp.ne.s32.totalorder %s2996_s25, 0 }
  0xa8   : > { %s2798_s20 = sand.u32 (!%p3016_p10), 1, %s2461_s19   ;;  %p3017_p7 = scmp.ne.s32.totalorder (!%p3016_p10), %s3009_s2, 0 }
  0xa9   : > { %550 = sbr.rel (%p3016_p10) target bundleno = 1483 (0x5cb), region = 76  ;;  %s2801_s22 = sshll.u32 (!%p3016_p10), %s2798_s20, 4 }
  0xaa   : > { %s553_s6 = scalar_lea.sflag (!%p3016_p10), [#allocation3], %s2798_s20  ;;  %s556_s30 = scalar_lea.vmem (!%p3016_p10), [#allocation2], %s2801_s22 }
  0xae   : > { %2424 = dma.done.wait (%p3017_p7), %s553_s6, 256  }
  0xaf   : > { %2426 = vsyncadd (%p3017_p7), %s553_s6, 4294967040  ;;  %s561_s0 = sand.u32 1, %s2589_s24   ;;  %s1720_s8 = sshll.u32 %s2798_s20, 3 }
  0xb0   : > { %s562_s25 = scalar_lea.sflag [#allocation6], %s561_s0  ;;  %s2811_s27 = scalar_lea.vmem [#allocation5], %s1720_s8 }
  0xb1   : > { %2428 = dma.done.wait (%p3017_p7), %s562_s25, 128  }
  0xb2   : > { %2430 = vsyncadd (%p3017_p7), %s562_s25, 4294967168  ;;  %p3018_p3 = scmp.eq.s32.totalorder %s2589_s24, 0 }
  0xb4   : > { %2432 = dma.done.wait (%p3018_p3), [#allocation6], 2048   ;;  %p3019_p11 = pmov %p3018_p3 }
  0xb5   : > { %p3020_p12 = pmov %p3018_p3 }
  0xb6   : > { %2434 = vsyncadd (%p3019_p11), [#allocation6], 4294965248 }
  0xb7   : > { %2436 = dma.done.wait (%p3020_p12), [#allocation9], 3072   ;;  %p3021_p0 = pmov %p3018_p3 }
  0xb9   : > { %2438 = vsyncadd (%p3021_p0), [#allocation9], 4294964224  ;;  %p3022_p5 = pmov %p3021_p0 }
  0xba   : > { %p3023_p8 = pmov %p3021_p0 }
  0xbb   : > { %2440 = dma.done.wait (%p3022_p5), [#allocation12], 2048  }
  0xbc   : > { %2442 = vsyncadd (%p3023_p8), [#allocation12], 4294965248  ;;  %p3024_p9 = pmov %p3021_p0 }
  0xbd   : > { %p3025_p4 = pmov %p3021_p0 }
  0xbe   : > { %2444 = dma.done.wait (%p3024_p9), [#allocation15], 2048  }
  0xbf   : > { %2446 = vsyncadd (%p3025_p4), [#allocation15], 4294965248  ;;  %v2483_v0 = vmov 0.0   ;;  %v2049_v1 = vld [vmem:[#allocation7 + $0x78] sm:$0xff]   ;;  %v2051_v3 = vld [vmem:[#allocation7 + $0x70] sm:$0xff]   ;;  %vm2484_vm0 = vmmov 0  }
  0xc0   : > { %1865 = vmatprep.subr.bf16.mxu1 %v2483_v0  ;;  %v2050_v2 = vld [vmem:[#allocation7 + $0x38] sm:$0xff]   ;;  %1816 = vmatprep.subr.bf16.mxu0 %v2049_v1  ;;  %v2052_v4 = vld [vmem:[#allocation7 + $0x30] sm:$0xff]   ;;  %v2053_v5 = vld [vmem:[#allocation7 + $0x68] sm:$0xff]   ;;  %v2485_v55 = vmov 0   ;;  %s2885_s4 = scalar_lea.vmem [#allocation17], %s2801_s22  ;;  %s1814_s0 = sshll.u32 %s2589_s24, 8 }
  0xc1   : > { %1817 = vmatpush3.bf16.msra.mxu0 %v2050_v2  ;;  %v2054_v6 = vld [vmem:[#allocation7 + $0x28] sm:$0xff]   ;;  %v2055_v7 = vld [vmem:[#allocation7 + $0x60] sm:$0xff]   ;;  %v2057_v9 = vld [vmem:[#allocation7 + $0x58] sm:$0xff]   ;;  %1881 = vmatprep.mubr.msk.bf16.mxu1 %vm2484_vm0, %v2483_v0  ;;  %s1522_s2 = sshll.u32 %s2885_s4, 4  ;;  %s1494_s12 = scalar_lea.sflag [#allocation18], %s2798_s20  ;;  %s1523_s2 = int_to_ptr.vmem [resolvable:$true] %s1522_s2 }
  0xc2   : > { %1818 = vmatprep.subr.bf16.mxu0 %v2051_v3  ;;  %v2056_v8 = vld [vmem:[#allocation7 + $0x20] sm:$0xff]   ;;  %v2058_v10 = vld [vmem:[#allocation7 + $0x18] sm:$0xff]   ;;  %v2059_v11 = vld [vmem:[#allocation7 + $0x50] sm:$0xff]   ;;  %s2355_s28 = scalar_lea.vmem %s1523_s2, 256  ;;  %p3026_p2 = scmp.ne.s32.totalorder %s3010_s23, 0 }
  0xc3   : > { %v648_v12 = vld [vmem:[%s556_s30 + $0x8] sm:$0xff]  ;;  %v2060_v15 = vld [vmem:[#allocation7 + $0x10] sm:$0xff]   ;;  %v2063_v19 = vld [vmem:[#allocation7 + $0x40] sm:$0xff]   ;;  %p2356_p13 = scmp.ne.s32.totalorder %s1523_s2, %s2355_s28  ;;  %s2486_s14 = smov [#allocation17]  }
  0xc4   : > { %v650_v13 = vpack.c.bf16 %v648_v12, %v648_v12  ;;  %v2065_v14 = vld [vmem:[#allocation8 + $0x38] sm:$0xff]   ;;  %v2061_v16 = vld [vmem:[#allocation7 + $0x48] sm:$0xff]   ;;  %v2066_v17 = vld [vmem:[#allocation8 + $0x30] sm:$0xff]   ;;  %s2359_s26 = sshll.u32 %s2486_s14, 4  ;;  %s2360_s26 = int_to_ptr.vmem [resolvable:$false] %s2359_s26 }
  0xc5   : > { %1819 = vmatpush3.bf16.msra.mxu0 %v2052_v4  ;;  %1866 = vmatpush3.bf16.msra.mxu1 %v2065_v14  ;;  %v2062_v18 = vld [vmem:[#allocation7 + $0x8] sm:$0xff]   ;;  %v2064_v21 = vld [vmem:[#allocation7] sm:$0xff]   ;;  %v2069_v25 = vld [vmem:[#allocation8 + $0x18] sm:$0xff]   ;;  %p2357_p1 = pnand %p2356_p13, %p3026_p2  ;;  %s2361_s17 = scalar_lea.vmem %s2360_s26, 512 }
  0xc6   : > { %1820 = vmatprep.subr.bf16.mxu0 %v2053_v5  ;;  %818 = vmatprep.mubr.bf16.mxu0 %v650_v13  ;;  %v2067_v20 = vld [vmem:[#allocation8 + $0x28] sm:$0xff]   ;;  %v647_v22 = vld [vmem:[%s556_s30] sm:$0xff]  ;;  %v2097_v56 = vld [vmem:[#allocation11 + $0x38] sm:$0xff]   ;;  %p2362_p10 = scmp.lt.s32.totalorder %s1523_s2, %s2360_s26  ;;  %p2363_p7 = scmp.lt.s32.totalorder %s2361_s17, %s2355_s28 }
  0xc7   : > { %1867 = vmatprep.subr.bf16.mxu1 %v2483_v0  ;;  %v2068_v23 = vld [vmem:[#allocation8 + $0x20] sm:$0xff]   ;;  %v649_v24 = vpack.c.bf16 %v647_v22, %v647_v22  ;;  %v2070_v26 = vld [vmem:[#allocation8 + $0x10] sm:$0xff]   ;;  %v2071_v27 = vld [vmem:[#allocation8 + $0x8] sm:$0xff]   ;;  %p2358_p6 = pneg %p2357_p1 }
  0xc8   : > { %v2072_v28 = vld [vmem:[#allocation8] sm:$0xff]   ;;  %v2073_v29 = vld [vmem:[#allocation10 + $0x70] ss:$8 sps:$4 sm:$0xff]   ;;  %v2075_v30 = vld [vmem:[#allocation10 + $0x74] ss:$8 sps:$4 sm:$0xff]   ;;  %p2364_p3 = por %p2363_p7, %p2362_p10 }
  0xc9   : > { %1821 = vmatpush3.bf16.msra.mxu0 %v2054_v6  ;;  %1868 = vmatpush3.bf16.msra.mxu1 %v2066_v17  ;;  %v2078_v31 = vld [vmem:[#allocation10 + $0x64] ss:$8 sps:$4 sm:$0xff]   ;;  %v2076_v32 = vld [vmem:[#allocation10 + $0x60] ss:$8 sps:$4 sm:$0xff]   ;;  %v2081_v33 = vld [vmem:[#allocation10 + $0x54] ss:$8 sps:$4 sm:$0xff]  }
  0xca   : > { %1822 = vmatprep.subr.bf16.mxu0 %v2055_v7  ;;  %1869 = vmatprep.subr.bf16.mxu1 %v2483_v0  ;;  %v2079_v34 = vld [vmem:[#allocation10 + $0x50] ss:$8 sps:$4 sm:$0xff]   ;;  %v2084_v35 = vld [vmem:[#allocation10 + $0x44] ss:$8 sps:$4 sm:$0xff]   ;;  %v2082_v36 = vld [vmem:[#allocation10 + $0x40] ss:$8 sps:$4 sm:$0xff]   ;;  %p2365_p11 = pnand %p2364_p3, %p2358_p6 }
  0xcb   : > { %v2087_v37 = vld [vmem:[#allocation10 + $0x34] ss:$8 sps:$4 sm:$0xff]   ;;  %v2085_v38 = vld [vmem:[#allocation10 + $0x30] ss:$8 sps:$4 sm:$0xff]   ;;  %v2090_v39 = vld [vmem:[#allocation10 + $0x24] ss:$8 sps:$4 sm:$0xff]  }
  0xcc   : > { %v2088_v40 = vld [vmem:[#allocation10 + $0x20] ss:$8 sps:$4 sm:$0xff]   ;;  %v1729_v42 = vld [vmem:[%s2965_s3] ss:$0 sm:$0xff]  ;;  %v2093_v51 = vld [vmem:[#allocation10 + $0x14] ss:$8 sps:$4 sm:$0xff]  }
  0xcd   : > { %1823 = vmatpush3.bf16.msra.mxu0 %v2056_v8  ;;  %1870 = vmatpush3.bf16.msra.mxu1 %v2067_v20  ;;  %v2091_v52 = vld [vmem:[#allocation10 + $0x10] ss:$8 sps:$4 sm:$0xff]   ;;  %v2096_v53 = vld [vmem:[#allocation10 + $0x4] ss:$8 sps:$4 sm:$0xff]   ;;  %v2094_v54 = vld [vmem:[#allocation10] ss:$8 sps:$4 sm:$0xff]  }
  0xce   : > { %1824 = vmatprep.subr.bf16.mxu0 %v2057_v9  ;;  %1871 = vmatprep.subr.bf16.mxu1 %v2483_v0  ;;  %v1746_v57 = vld [vmem:[%s2967_s5] ss:$0 sm:$0xff]  ;;  %v2099_v4 = vld [vmem:[#allocation11 + $0x28] sm:$0xff]   ;;  %v2100_v5 = vld [vmem:[#allocation11 + $0x20] sm:$0xff]  }
  0xcf   : > { %v2098_v3 = vld [vmem:[#allocation11 + $0x30] sm:$0xff]   ;;  %v2101_v6 = vld [vmem:[#allocation11 + $0x18] sm:$0xff]   ;;  %v2103_v8 = vld [vmem:[#allocation11 + $0x8] sm:$0xff]  }
  0xd0   : > { %v2102_v7 = vld [vmem:[#allocation11 + $0x10] sm:$0xff]   ;;  %v2104_v9 = vld [vmem:[#allocation11] sm:$0xff]   ;;  %v2107_v12 = vld [vmem:[#allocation13 + $0x28] sm:$0xff]  }
  0xd1   : > { %1825 = vmatpush3.bf16.msra.mxu0 %v2058_v10  ;;  %1872 = vmatpush3.bf16.msra.mxu1 %v2068_v23  ;;  %v2105_v10 = vld [vmem:[#allocation13 + $0x38] sm:$0xff]   ;;  %v2108_v13 = vld [vmem:[#allocation13 + $0x20] sm:$0xff]  }
  0xd2   : > { %1826 = vmatprep.subr.bf16.mxu0 %v2059_v11  ;;  %1873 = vmatprep.subr.bf16.mxu1 %v2483_v0  ;;  %v2106_v11 = vld [vmem:[#allocation13 + $0x30] sm:$0xff]   ;;  %v2109_v14 = vld [vmem:[#allocation13 + $0x18] sm:$0xff]  }
  0xd5   : > { %1827 = vmatpush3.bf16.msra.mxu0 %v2060_v15  ;;  %1874 = vmatpush3.bf16.msra.mxu1 %v2069_v25  ;;  %v2110_v15 = vld [vmem:[#allocation13 + $0x10] sm:$0xff]  }
  0xd6   : > { %1828 = vmatprep.subr.bf16.mxu0 %v2061_v16  ;;  %1875 = vmatprep.subr.bf16.mxu1 %v2483_v0  ;;  %v961_v16 = vlaneseq }
  0xd8   : > { %v2873_v17 = vshrl.u32 %v961_v16, 7 }
  0xd9   : > { %1829 = vmatpush3.bf16.msra.mxu0 %v2062_v18  ;;  %1876 = vmatpush3.bf16.msra.mxu1 %v2070_v26 }
  0xda   : > { %1830 = vmatprep.subr.bf16.mxu0 %v2063_v19  ;;  %1877 = vmatprep.subr.bf16.mxu1 %v2483_v0  ;;  %v963_v18 = vsub.s32 0, %v2873_v17  ;;  %v959_v19 = vld [vmem:[%s2969_s7] sm:$0x3]  ;;  %v967_v20 = vsub.s32 1, %v2873_v17 }
  0xdc   : > { %v968_v22 = vrot.slane %v959_v19, %v967_v20 }
  0xdd   : > { %1831 = vmatpush3.bf16.msra.mxu0 %v2064_v21  ;;  %1878 = vmatpush3.bf16.msra.mxu1 %v2071_v27  ;;  %v964_v21 = vrot.slane %v959_v19, %v963_v18 }
  0xde   : > { %1879 = vmatprep.subr.bf16.mxu1 %v2483_v0  ;;  %1051 = vmatprep.subr.bf16.mxu0 %v2075_v30 }
  0xe0   : > { %819 = vmatmul.mubr.bf16.vlgmr.msra.gmra.mxu0 %v649_v24 }
  0xe1   : > { %1880 = vmatpush3.bf16.msra.mxu1 %v2072_v28  ;;  %1052 = vmatpush1.bf16.msra.mxu0 %v2073_v29 }
  0xe2   : > { %1885 = vmatprep.subr.bf16.mxu1 %v2483_v0  ;;  %1053 = vmatprep.subr.bf16.mxu0 %v2078_v31  ;;  %v1097_v31 = vld [vmem:[%s2811_s27] sm:$0xff]  ;;  %s1520_s27 = scalar_lea.hbm %s2977_s15, %s1814_s0 }
  0xe3   : > { %1083 = vmatprep.mubr.bf16.mxu0 %v2485_v55 }
  0xe5   : > { %1054 = vmatpush1.bf16.msra.mxu0 %v2076_v32 }
  0xe6   : > { %1055 = vmatprep.subr.bf16.mxu0 %v2081_v33 }
  0xe9   : > { %1056 = vmatpush1.bf16.msra.mxu0 %v2079_v34 }
  0xea   : > { %1057 = vmatprep.subr.bf16.mxu0 %v2084_v35 }
  0xed   : > { %1058 = vmatpush1.bf16.msra.mxu0 %v2082_v36  ;;  %v2111_v36 = vld [vmem:[#allocation13 + $0x8] sm:$0xff]  }
  0xee   : > { %1059 = vmatprep.subr.bf16.mxu0 %v2087_v37  ;;  %v2112_v37 = vld [vmem:[#allocation13] sm:$0xff]  }
  0xf1   : > { %1060 = vmatpush1.bf16.msra.mxu0 %v2085_v38  ;;  %v2113_v38 = vld [vmem:[#allocation14 + $0x70] ss:$8 sps:$4 sm:$0xff]  }
  0xf2   : > { %1061 = vmatprep.subr.bf16.mxu0 %v2090_v39  ;;  %v2115_v39 = vld [vmem:[#allocation14 + $0x74] ss:$8 sps:$4 sm:$0xff]  }
  0xf5   : > { %1062 = vmatpush1.bf16.msra.mxu0 %v2088_v40  ;;  %v2118_v40 = vld [vmem:[#allocation14 + $0x64] ss:$8 sps:$4 sm:$0xff]  }
  0xf6   : > { %1063 = vmatprep.subr.bf16.mxu0 %v2093_v51 }
  0xf9   : > { %1064 = vmatpush1.bf16.msra.mxu0 %v2091_v52 }
  0xfa   : > { %1065 = vmatprep.subr.bf16.mxu0 %v2096_v53 }
  0xfd   : > { %1066 = vmatpush1.bf16.msra.mxu0 %v2094_v54 }
  0xfe   : > { %1905 = vmatprep.subr.bf16.mxu0 %v2483_v0 }
 0x1a0   : > { %v1832_v41 = vpop.f32.mrf.mxu0 }
 0x1a2   : > { %v1833_v43 = vpop.f32.mrf.mxu0 }
 0x1a3   : > { %v1834_v44 = vadd.f32 %v1833_v43, %v1832_v41  ;;  %v2116_v41 = vld [vmem:[#allocation14 + $0x60] ss:$8 sps:$4 sm:$0xff]   ;;  %v2119_v43 = vld [vmem:[#allocation14 + $0x50] ss:$8 sps:$4 sm:$0xff]  }
 0x1a4   : > { %v1835_v45 = vpop.f32.mrf.mxu0 }
 0x1a5   : > { %v821_v46 = vadd.f32 %v1834_v44, %v1729_v42  ;;  %v2121_v42 = vld [vmem:[#allocation14 + $0x54] ss:$8 sps:$4 sm:$0xff]   ;;  %v2124_v44 = vld [vmem:[#allocation14 + $0x44] ss:$8 sps:$4 sm:$0xff]   ;;  %v2122_v45 = vld [vmem:[#allocation14 + $0x40] ss:$8 sps:$4 sm:$0xff]  }
 0x1a6   : > { %v1836_v47 = vpop.f32.mrf.mxu0 }
 0x1a7   : > { %v826_v48 = vmul.f32 0.2, %v821_v46  ;;  %v2130_v47 = vld [vmem:[#allocation14 + $0x24] ss:$8 sps:$4 sm:$0xff]  }
 0x1a9   : > { %v827_v49 = vmax.f32 %v821_v46, %v826_v48  ;;  %v2127_v46 = vld [vmem:[#allocation14 + $0x34] ss:$8 sps:$4 sm:$0xff]   ;;  %v2128_v48 = vld [vmem:[#allocation14 + $0x20] ss:$8 sps:$4 sm:$0xff]  }
 0x1ab   : > { %v828_v50 = vpack.c.bf16 %v827_v49, %v827_v49  ;;  %v1771_v49 = vld [vmem:[%s2971_s9] ss:$0 sm:$0xff] }
 0x1ad   : > { %1882 = vmatmul.mubr.bf16.vlgmr.msra.gmra.mxu1 %v828_v50 }
 0x1ae   : > { %1901 = vmatprep.mubr.msk.bf16.mxu1 %vm2484_vm0, %v2483_v0  ;;  %1886 = vmatpush3.bf16.msra.mxu1 %v2097_v56 }
 0x1af   : > { %1887 = vmatprep.subr.bf16.mxu1 %v2483_v0 }
 0x1b2   : > { %1888 = vmatpush3.bf16.msra.mxu1 %v2098_v3 }
 0x1b3   : > { %1889 = vmatprep.subr.bf16.mxu1 %v2483_v0 }
 0x1b6   : > { %1890 = vmatpush3.bf16.msra.mxu1 %v2099_v4 }
 0x1b7   : > { %1891 = vmatprep.subr.bf16.mxu1 %v2483_v0 }
 0x1ba   : > { %1892 = vmatpush3.bf16.msra.mxu1 %v2100_v5 }
 0x1bb   : > { %1893 = vmatprep.subr.bf16.mxu1 %v2483_v0 }
 0x1be   : > { %1894 = vmatpush3.bf16.msra.mxu1 %v2101_v6 }
 0x1bf   : > { %1895 = vmatprep.subr.bf16.mxu1 %v2483_v0 }
 0x1c2   : > { %1896 = vmatpush3.bf16.msra.mxu1 %v2102_v7 }
 0x1c3   : > { %1897 = vmatprep.subr.bf16.mxu1 %v2483_v0 }
 0x1c6   : > { %1898 = vmatpush3.bf16.msra.mxu1 %v2103_v8 }
 0x1c7   : > { %1899 = vmatprep.subr.bf16.mxu1 %v2483_v0 }
 0x1ca   : > { %1900 = vmatpush3.bf16.msra.mxu1 %v2104_v9 }
 0x1cb   : > { %1437 = vmatprep.subr.bf16.mxu1 %v2115_v39 }
 0x26d   : > { %v934_v58 = vpop.f32.mrf.mxu1 }
 0x26e   : > { %v935_v59 = vadd.f32 %v1746_v57, %v934_v58  ;;  %v2133_v58 = vld [vmem:[#allocation14 + $0x14] ss:$8 sps:$4 sm:$0xff]  }
 0x26f   : > { %v1883_v60 = vpop.f32.mrf.mxu1 }
 0x270   : > { %v940_v61 = vmul.f32 0.2, %v935_v59  ;;  %v2136_v60 = vld [vmem:[#allocation14 + $0x4] ss:$8 sps:$4 sm:$0xff]  }
 0x271   : > { %v937_v62 = vpop.f32.mrf.mxu1 }
 0x272   : > { %v941_v63 = vmax.f32 %v935_v59, %v940_v61  ;;  %v2131_v59 = vld [vmem:[#allocation14 + $0x10] ss:$8 sps:$4 sm:$0xff]   ;;  %v2134_v61 = vld [vmem:[#allocation14] ss:$8 sps:$4 sm:$0xff]  }
 0x273   : > { %v1884_v1 = vpop.f32.mrf.mxu1  ;;  %v1780_v62 = vld [vmem:[%s2973_s11] ss:$0 sm:$0xff] }
 0x274   : > { %v942_v2 = vpack.c.bf16 %v941_v63, %v941_v63 }
 0x276   : > { %1084 = vmatmul.mubr.bf16.vlgmr.msra.gmra.mxu0 %v942_v2 }
 0x277   : > { %1921 = vmatprep.mubr.msk.bf16.mxu0 %vm2484_vm0, %v2483_v0  ;;  %1906 = vmatpush3.bf16.msra.mxu0 %v2105_v10 }
 0x278   : > { %1907 = vmatprep.subr.bf16.mxu0 %v2483_v0 }
 0x27b   : > { %1908 = vmatpush3.bf16.msra.mxu0 %v2106_v11 }
 0x27c   : > { %1909 = vmatprep.subr.bf16.mxu0 %v2483_v0 }
 0x27f   : > { %1910 = vmatpush3.bf16.msra.mxu0 %v2107_v12 }
 0x280   : > { %1911 = vmatprep.subr.bf16.mxu0 %v2483_v0 }
 0x283   : > { %1912 = vmatpush3.bf16.msra.mxu0 %v2108_v13 }
 0x284   : > { %1913 = vmatprep.subr.bf16.mxu0 %v2483_v0 }
 0x287   : > { %1914 = vmatpush3.bf16.msra.mxu0 %v2109_v14 }
 0x288   : > { %1915 = vmatprep.subr.bf16.mxu0 %v2483_v0 }
 0x28b   : > { %1916 = vmatpush3.bf16.msra.mxu0 %v2110_v15 }
 0x28c   : > { %1917 = vmatprep.subr.bf16.mxu0 %v2483_v0 }
 0x28f   : > { %1918 = vmatpush3.bf16.msra.mxu0 %v2111_v36 }
 0x290   : > { %1919 = vmatprep.subr.bf16.mxu0 %v2483_v0  ;;  %v2125_v0 = vld [vmem:[#allocation14 + $0x30] ss:$8 sps:$4 sm:$0xff]  }
 0x293   : > { %1920 = vmatpush3.bf16.msra.mxu0 %v2112_v37 }
 0x336   : > { %v1085_v23 = vpop.f32.mrf.mxu0 }
 0x337   : > { %v1086_v24 = vadd.f32 %v1085_v23, %v964_v21 }
 0x338   : > { %v1087_v25 = vpop.f32.mrf.mxu0 }
 0x339   : > { %1092 = vst [vmem:[%s2885_s4] sm:$0xff] %v1086_v24  ;;  %v1088_v26 = vadd.f32 %v1087_v25, %v968_v22 }
 0x33a   : > { %v1089_v27 = vpop.f32.mrf.mxu0 }
 0x33b   : > { %1093 = vst [vmem:[%s2885_s4 + $0x8] sm:$0xff] %v1088_v26  ;;  %v1094_v28 = vmul.f32 0.5, %v1088_v26 }
 0x33c   : > { %v1090_v29 = vpop.f32.mrf.mxu0 }
 0x33d   : > { %v1095_v30 = vmul.f32 1.442695, %v1094_v28 }
 0x33f   : > { %2137 = vpow2.f32 %v1095_v30 }
 0x34c   : > { %v2138_v32 = vpop.eup %2137 }
 0x34d   : > { %v1098_v33 = vmul.f32 %v2138_v32, %v1097_v31 }
 0x34f   : > { %v1099_v34 = vadd.f32 %v1098_v33, %v1086_v24 }
 0x351   : > { %v1100_v35 = vpack.c.bf16 %v1099_v34, %v1099_v34 }
 0x353   : > { %1902 = vmatmul.mubr.bf16.vlgmr.msra.gmra.mxu1 %v1100_v35 }
 0x354   : > { %1469 = vmatprep.mubr.bf16.mxu1 %v2485_v55  ;;  %1438 = vmatpush1.bf16.msra.mxu1 %v2113_v38 }
 0x355   : > { %1439 = vmatprep.subr.bf16.mxu1 %v2118_v40 }
 0x358   : > { %1440 = vmatpush1.bf16.msra.mxu1 %v2116_v41 }
 0x359   : > { %1441 = vmatprep.subr.bf16.mxu1 %v2121_v42 }
 0x35c   : > { %1442 = vmatpush1.bf16.msra.mxu1 %v2119_v43 }
 0x35d   : > { %1443 = vmatprep.subr.bf16.mxu1 %v2124_v44 }
 0x360   : > { %1444 = vmatpush1.bf16.msra.mxu1 %v2122_v45 }
 0x361   : > { %1445 = vmatprep.subr.bf16.mxu1 %v2127_v46 }
 0x364   : > { %1446 = vmatpush1.bf16.msra.mxu1 %v2125_v0 }
 0x365   : > { %1447 = vmatprep.subr.bf16.mxu1 %v2130_v47 }
 0x368   : > { %1448 = vmatpush1.bf16.msra.mxu1 %v2128_v48 }
 0x369   : > { %1449 = vmatprep.subr.bf16.mxu1 %v2133_v58 }
 0x36c   : > { %1450 = vmatpush1.bf16.msra.mxu1 %v2131_v59 }
 0x36d   : > { %1451 = vmatprep.subr.bf16.mxu1 %v2136_v60 }
 0x370   : > { %1452 = vmatpush1.bf16.msra.mxu1 %v2134_v61 }
 0x413   : > { %v1206_v50 = vpop.f32.mrf.mxu1 }
 0x414   : > { %v1207_v51 = vadd.f32 %v1771_v49, %v1206_v50 }
 0x415   : > { %v1903_v52 = vpop.f32.mrf.mxu1 }
 0x416   : > { %v1212_v53 = vmul.f32 0.2, %v1207_v51 }
 0x417   : > { %v1209_v54 = vpop.f32.mrf.mxu1 }
 0x418   : > { %v1213_v55 = vmax.f32 %v1207_v51, %v1212_v53 }
 0x419   : > { %v1904_v56 = vpop.f32.mrf.mxu1 }
 0x41a   : > { %v1214_v57 = vpack.c.bf16 %v1213_v55, %v1213_v55 }
 0x41c   : > { %1922 = vmatmul.mubr.bf16.vlgmr.msra.gmra.mxu0 %v1214_v57 }
 0x4dc   : > { %v1320_v63 = vpop.f32.mrf.mxu0 }
 0x4dd   : > { %v1321_v1 = vadd.f32 %v1780_v62, %v1320_v63 }
 0x4de   : > { %v1923_v2 = vpop.f32.mrf.mxu0 }
 0x4df   : > { %v1326_v3 = vmul.f32 0.2, %v1321_v1 }
 0x4e0   : > { %v1323_v4 = vpop.f32.mrf.mxu0 }
 0x4e1   : > { %v1327_v5 = vmax.f32 %v1321_v1, %v1326_v3 }
 0x4e2   : > { %v1924_v6 = vpop.f32.mrf.mxu0 }
 0x4e3   : > { %v1328_v7 = vpack.c.bf16 %v1327_v5, %v1327_v5 }
 0x4e5   : > { %1470 = vmatmul.mubr.bf16.vlgmr.msra.gmra.mxu1 %v1328_v7 }
 0x4e6   : > { %2368 = shalt.err (!%p2365_p11)
}
 0x4e7   : > { %s2369_s29 = scalar_lea.hbm %s1520_s27, 256  ;;  %s2373_s6 = scalar_lea.hbm %s2977_s15, 512 }
 0x4e8   : > { %p2370_p12 = scmp.ne.s32.totalorder %s1520_s27, %s2369_s29  ;;  %p2374_p8 = scmp.lt.s32.totalorder %s1520_s27, %s2977_s15 }
 0x4e9   : > { %p2375_p9 = scmp.lt.s32.totalorder %s2373_s6, %s2369_s29 }
 0x4ea   : > { %p2371_p0 = pnand %p2370_p12, %p3026_p2 }
 0x4eb   : > { %p2376_p4 = por %p2375_p9, %p2374_p8 }
 0x4ec   : > { %p2372_p5 = pneg %p2371_p0 }
 0x4ee   : > { %p2377_p13 = pnand %p2376_p4, %p2372_p5 }
 0x4f0   : > { %2380 = shalt.err (!%p2377_p13)
}
 0x4f1   : > { %1954 = dma.vmem_to_hbm [thread:$0]  (%p3026_p2), %s1523_s2, 256, %s1520_s27, %s1494_s12  }
 0x4f2   : > { %s3027_s14 = sld [smem:[#allocation36_spill]]  ;;  %s638_s27 = scalar_lea.vmem [#allocation16], %s2801_s22 }
 0x4f3   : > { %s1508_s2 = sshll.u32 %s638_s27, 4  ;;  %s3028_s17 = sld [smem:[#allocation37_spill]]  ;;  %s1509_s2 = int_to_ptr.vmem [resolvable:$true] %s1508_s2 }
 0x4f4   : > { %s1489_s4 = scalar_lea.sflag [#allocation4], %s2798_s20  ;;  %s2381_s10 = scalar_lea.vmem %s1509_s2, 256 }
 0x4f5   : > { %p2382_p1 = scmp.ne.s32.totalorder %s1509_s2, %s2381_s10  ;;  %s2487_s6 = smov [#allocation16]  }
 0x4f6   : > { %s2385_s22 = sshll.u32 %s2487_s6, 4  ;;  %s2386_s22 = int_to_ptr.vmem [resolvable:$false] %s2385_s22 }
 0x4f7   : > { %p2383_p6 = pnand %p2382_p1, %p3026_p2  ;;  %s2387_s30 = scalar_lea.vmem %s2386_s22, 512 }
 0x4f8   : > { %v1345_v8 = vld [vmem:[%s3027_s14] sm:$0x3]  ;;  %p2388_p7 = scmp.lt.s32.totalorder %s1509_s2, %s2386_s22  ;;  %p2389_p3 = scmp.lt.s32.totalorder %s2387_s30, %s2381_s10 }
 0x4f9   : > { %v1350_v9 = vrot.slane %v1345_v8, %v963_v18  ;;  %v1354_v10 = vrot.slane %v1345_v8, %v967_v20  ;;  %s1506_s29 = scalar_lea.hbm %s3028_s17, %s1814_s0  ;;  %p2384_p10 = pneg %p2383_p6 }
 0x4fa   : > { %p2390_p11 = por %p2389_p3, %p2388_p7 }
 0x4fc   : > { %p2391_p12 = pnand %p2390_p11, %p2384_p10 }
 0x5a5   : > { %v1471_v11 = vpop.f32.mrf.mxu1 }
 0x5a6   : > { %v1472_v12 = vadd.f32 %v1471_v11, %v1350_v9 }
 0x5a7   : > { %v1473_v13 = vpop.f32.mrf.mxu1 }
 0x5a8   : > { %v1478_v14 = vmul.f32 0.5, %v1472_v12  ;;  %v1474_v15 = vadd.f32 %v1473_v13, %v1354_v10 }
 0x5a9   : > { %v1475_v16 = vpop.f32.mrf.mxu1 }
 0x5aa   : > { %2139 = vtanh.f32 %v1478_v14  ;;  %v1479_v19 = vmul.f32 0.5, %v1474_v15 }
 0x5ab   : > { %v1476_v21 = vpop.f32.mrf.mxu1 }
 0x5ac   : > { %2141 = vtanh.f32 %v1479_v19 }
 0x5b7   : > { %v2140_v22 = vpop.eup %2139 }
 0x5b8   : > { %v1482_v23 = vadd.f32 1.0, %v2140_v22 }
 0x5b9   : > { %v2142_v24 = vpop.eup %2141 }
 0x5ba   : > { %v1484_v17 = vmul.f32 0.5, %v1482_v23  ;;  %v1483_v18 = vadd.f32 1.0, %v2142_v24 }
 0x5bc   : > { %v1485_v20 = vmul.f32 0.5, %v1483_v18  ;;  %1486 = vst [vmem:[%s638_s27] sm:$0xff] %v1484_v17 }
 0x5be   : > { %1487 = vst [vmem:[%s638_s27 + $0x8] sm:$0xff] %v1485_v20 }
 0x5bf   : > { %2394 = shalt.err (!%p2391_p12)
}
 0x5c0   : > { %s2395_s24 = scalar_lea.hbm %s1506_s29, 256  ;;  %s2399_s8 = scalar_lea.hbm %s3028_s17, 512 }
 0x5c1   : > { %p2396_p0 = scmp.ne.s32.totalorder %s1506_s29, %s2395_s24  ;;  %p2400_p9 = scmp.lt.s32.totalorder %s1506_s29, %s3028_s17 }
 0x5c2   : > { %p2401_p4 = scmp.lt.s32.totalorder %s2399_s8, %s2395_s24 }
 0x5c3   : > { %p2397_p5 = pnand %p2396_p0, %p3026_p2 }
 0x5c4   : > { %p2402_p13 = por %p2401_p4, %p2400_p9 }
 0x5c5   : > { %p2398_p8 = pneg %p2397_p5 }
 0x5c7   : > { %p2403_p1 = pnand %p2402_p13, %p2398_p8 }
 0x5c9   : > { %2406 = shalt.err (!%p2403_p1)
}
 0x5ca   : > { %1953 = dma.vmem_to_hbm [thread:$0]  (%p3026_p2), %s1509_s2, 256, %s1506_s29, %s1489_s4  }
 0x5cb PF: > { %s1534_s14 = sand.u32 1, %s2457_s18   ;;  %p3029_p6 = scmp.ne.s32.totalorder %s3011_s13, 0 }
 0x5cc   : > { %p3030_p10 = scmp.ge.s32.totalorder %s2469_s21, 2  ;;  %s1535_s27 = scalar_lea.sflag [#allocation4], %s1534_s14 }
 0x5ce   : > { %p1984_p7 = pnand %p3030_p10, %p3029_p6 }
 0x5d0   : > { %p1985_p3 = pneg %p1984_p7 }
 0x5d2   : > { %2448 = dma.done.wait (%p1985_p3), %s1535_s27, 256  }
 0x5d3   : > { %2450 = vsyncadd (%p1985_p3), %s1535_s27, 4294967040  ;;  %s1544_s12 = scalar_lea.sflag [#allocation18], %s1534_s14 }
 0x5d4   : > { %2452 = dma.done.wait (%p1985_p3), %s1544_s12, 256  }
 0x5d5   : > { %2454 = vsyncadd (%p1985_p3), %s1544_s12, 4294967040  ;;  %s3031_s26 = sld [smem:[#allocation27_spill]]  ;;  %p38_p2 = scmp.ge.s32.totalorder %s2689_s16, 4  }
 0x5d6   : > { %s3032_s20 = sld [smem:[#allocation28_spill]]  ;;  %s3033_s18 = smov %s2461_s19 }
 0x5d7   : > { %s3035_s21 = smov %s2689_s16  ;;  %40 = sbr.rel (!%p38_p2) target bundleno = 22 (0x16), region = 175 }
 0x5db   : > { %s3034_s19 = smov %s3031_s26 }
 0x5dc   :  { %1549 = vsyncpa [#allocation3], 1 }
 0x5dd   :  { %1551 = vsyncpa [#allocation3 + $0x1], 1 }
 0x5de   :  { %1552 = vsyncpa [#allocation6], 1 }
 0x5df   :  { %1554 = vsyncpa [#allocation6 + $0x1], 1 }
 0x5e0   :  { %1555 = vsyncpa [#allocation9], 1 }
 0x5e1   :  { %1556 = vsyncpa [#allocation12], 1 }
 0x5e2   :  { %1557 = vsyncpa [#allocation15], 1 }
 0x5e3   :  { %1558 = vsyncpa [#allocation4], 1 }
 0x5e4   :  { %1560 = vsyncpa [#allocation4 + $0x1], 1 }
 0x5e5   :  { %1561 = vsyncpa [#allocation18], 1 }
 0x5e6   :  { %1563 = vsyncpa [#allocation18 + $0x1], 1 }

</bundles_post_ra>
